<compile_context>
chip_gen: v5e
topology: v5e:2x2
jax: 0.10.0
libtpu: 0.0.40
codegen_flags: <defaults>
</compile_context>

<pallas_src>
import functools

import numpy as np
import jax
import jax.numpy as jnp
from jax.experimental import pallas as pl
from jax.experimental.pallas import tpu as pltpu


# ----------------------------------------------------------------------------
# Pallas kernels
# ----------------------------------------------------------------------------

def _conv_mm_kernel(x_ref, w_ref, scale_ref, bias_ref, o_ref, xcol_ref, *,
                    offsets, tm, relu):
    """ConvBNReLU on one M tile, taps folded into a single MXU matmul.

    x_ref:     (1, Cin, TM + 2*MR)  halo'd input tile (padded-flat layout)
    w_ref:     (Cout, K*Cin)        folded weights        (VMEM resident)
    scale_ref: (Cout, 1)            folded BN scale       (VMEM resident)
    bias_ref:  (Cout, 1)            folded BN bias        (VMEM resident)
    o_ref:     (Cout, TM)
    xcol_ref:  (K*Cin, TM)          VMEM scratch: gathered im2col tile
    """
    cin = x_ref.shape[1]
    xt = x_ref[0]                                   # (Cin, TM + 2*MR)
    for k, off in enumerate(offsets):               # static unrolled tap windows
        xcol_ref[k * cin:(k + 1) * cin, :] = xt[:, off:off + tm]
    acc = jnp.dot(w_ref[...], xcol_ref[...], preferred_element_type=jnp.float32)
    y = acc * scale_ref[...] + bias_ref[...]
    if relu:
        y = jnp.maximum(y, 0.0)
    o_ref[...] = y


def _pool_kernel(x_ref, o_ref):
    """adaptive_max_pool + adaptive_avg_pool over rh*rw stacked phase-slabs.

    x_ref: (R, C, TM);  o_ref: (C, TM)
    """
    x = x_ref[...]
    r = x.shape[0]
    o_ref[...] = jnp.max(x, axis=0) + jnp.sum(x, axis=0) * (1.0 / r)


def _trans0_kernel(l_ref, m_ref, s_ref, w_ref, scale_ref, bias_ref, o_ref):
    """Fused concat([l,m,s], channel) + 1x1 ConvBNReLU on one M tile."""
    x = jnp.concatenate([l_ref[...], m_ref[...], s_ref[...]], axis=0)  # (3C, TM)
    y = jnp.dot(w_ref[...], x, preferred_element_type=jnp.float32)
    o_ref[...] = jnp.maximum(y * scale_ref[...] + bias_ref[...], 0.0)


def _fuse_kernel(a_ref, w3_ref, b3_ref, l_ref, m_ref, s_ref, o_ref):
    """Fused trans3 (1x1 conv -> 3 maps) + softmax + attention-weighted sum."""
    attn = jnp.dot(w3_ref[...], a_ref[...],
                   preferred_element_type=jnp.float32) + b3_ref[...]   # (3, TM)
    amax = jnp.max(attn, axis=0, keepdims=True)
    e = jnp.exp(attn - amax)
    w = e * pl.reciprocal(jnp.sum(e, axis=0, keepdims=True), approx=True)
    o_ref[...] = (w[0:1, :] * l_ref[...] + w[1:2, :] * m_ref[...]
                  + w[2:3, :] * s_ref[...])


# ----------------------------------------------------------------------------
# Spec helpers
# ----------------------------------------------------------------------------

def _round_up(x, m):
    return (x + m - 1) // m * m


def _pick_tm(m, cap=512):
    """M-tile size: multiple of 128, at most `cap`."""
    return min(cap, _round_up(m, 128))


def _resident(shape):
    """Full-array block whose index never changes -> stays resident in VMEM."""
    nd = len(shape)
    return pl.BlockSpec(tuple(shape), lambda t, _nd=nd: (0,) * _nd)


def _mtile(rows, tm):
    """(rows, TM) block tiled along the flattened M axis."""
    return pl.BlockSpec((rows, tm), lambda t: (0, t))


_PARALLEL = pltpu.CompilerParams(dimension_semantics=("parallel",))


# ----------------------------------------------------------------------------
# Layer wrappers (channels-first (C, N, H, W) in / out)
# ----------------------------------------------------------------------------

def conv_bn_act(x, w, scale, bias, relu=True, tm_cap=512):
    """ConvBNReLU, stride 1, 'same' padding, on a channels-first input."""
    cin, n, h, wd = x.shape
    kh, kw, _, cout = w.shape
    pad = kh // 2
    hp, wp = h + 2 * pad, wd + 2 * pad
    mp = n * hp * wp

    tm = _pick_tm(mp, tm_cap)
    l_out = _round_up(mp, tm)
    nt = l_out // tm
    mr = pad * wp + pad                  # max tap offset in padded-flat index space
    tmh = tm + 2 * mr

    # One padded channels-first slab; overlapping halo'd M tiles (~1.1x copy, not Kx).
    xp = jnp.pad(x, ((0, 0), (0, 0), (pad, pad), (pad, pad))).reshape(cin, mp)
    xslab = jnp.pad(xp, ((0, 0), (mr, (l_out - mp) + mr)))           # (Cin, L + 2*MR)
    tiles = jnp.stack([xslab[:, t * tm:t * tm + tmh] for t in range(nt)],
                      axis=0)                                        # (nt, Cin, TMH)

    # Tap k at (ki, kj): local window offset inside the halo'd tile is ki*Wp + kj.
    offsets = [ki * wp + kj for ki in range(kh) for kj in range(kw)]
    wf = jnp.transpose(w, (3, 0, 1, 2)).reshape(cout, kh * kw * cin)  # (Cout, K*Cin)

    out = pl.pallas_call(
        functools.partial(_conv_mm_kernel, offsets=offsets, tm=tm, relu=relu),
        grid=(nt,),
        in_specs=[
            pl.BlockSpec((1, cin, tmh), lambda t: (t, 0, 0)),
            _resident(wf.shape),
            _resident((cout, 1)),
            _resident((cout, 1)),
        ],
        out_specs=_mtile(cout, tm),
        out_shape=jax.ShapeDtypeStruct((cout, l_out), jnp.float32),
        scratch_shapes=[pltpu.VMEM((kh * kw * cin, tm), jnp.float32)],
        compiler_params=_PARALLEL,
    )(tiles, wf,
      scale.reshape(cout, 1).astype(jnp.float32),
      bias.reshape(cout, 1).astype(jnp.float32))

    out = out[:, :mp].reshape(cout, n, hp, wp)
    return out[:, :, pad:pad + h, pad:pad + wd]


def pool_max_plus_avg(x, size, tm_cap=512):
    """adaptive_max_pool2d(x,size) + adaptive_avg_pool2d(x,size), integer ratio."""
    c, n, h, w = x.shape
    th, tw = size
    assert h % th == 0 and w % tw == 0
    # TODO(synk): non-integer-ratio adaptive pooling windows are not implemented.
    # TODO(synk): could be fused into the adjacent conv to avoid one HBM round trip.
    rh, rw = h // th, w // tw
    mo = n * th * tw
    parts = [x[:, :, di::rh, dj::rw].reshape(c, mo)
             for di in range(rh) for dj in range(rw)]
    stacked = jnp.stack(parts, axis=0)                       # (R, C, Mo): 1x relayout
    tm = _pick_tm(mo, tm_cap)
    l_out = _round_up(mo, tm)
    nt = l_out // tm
    stacked = jnp.pad(stacked, ((0, 0), (0, 0), (0, l_out - mo)))
    r = rh * rw

    out = pl.pallas_call(
        _pool_kernel,
        grid=(nt,),
        in_specs=[pl.BlockSpec((r, c, tm), lambda t: (0, 0, t))],
        out_specs=_mtile(c, tm),
        out_shape=jax.ShapeDtypeStruct((c, l_out), jnp.float32),
        compiler_params=_PARALLEL,
    )(stacked)
    return out[:, :mo].reshape(c, n, th, tw)


def trans0_fused(l3, m1, s3, w, scale, bias, tm_cap=512):
    """1x1 ConvBNReLU on concat([l3, m1, s3], C) without materializing the concat."""
    c, n, h, wd = l3.shape
    cout = w.shape[-1]
    m = n * h * wd
    tm = _pick_tm(m, tm_cap)
    l_out = _round_up(m, tm)
    nt = l_out // tm

    def flat(a):
        return jnp.pad(a.reshape(c, m), ((0, 0), (0, l_out - m)))

    wf = w.reshape(3 * c, cout).T                                   # (Cout, 3C)
    out = pl.pallas_call(
        _trans0_kernel,
        grid=(nt,),
        in_specs=[_mtile(c, tm), _mtile(c, tm), _mtile(c, tm),
                  _resident(wf.shape), _resident((cout, 1)), _resident((cout, 1))],
        out_specs=_mtile(cout, tm),
        out_shape=jax.ShapeDtypeStruct((cout, l_out), jnp.float32),
        compiler_params=_PARALLEL,
    )(flat(l3), flat(m1), flat(s3), wf,
      scale.reshape(cout, 1).astype(jnp.float32),
      bias.reshape(cout, 1).astype(jnp.float32))
    return out[:, :m].reshape(cout, n, h, wd)


def fuse(a, trans3_params, l3, m1, s3, tm_cap=512):
    """Fused trans3 (Conv2d(C,3,1)) + softmax over the 3 maps + weighted sum."""
    w, scale, bias = trans3_params
    c, n, h, wd = l3.shape
    m = n * h * wd
    tm = _pick_tm(m, tm_cap)
    l_out = _round_up(m, tm)
    nt = l_out // tm

    def flat(x):
        return jnp.pad(x.reshape(c, m), ((0, 0), (0, l_out - m)))

    # Fold the (identity) scale of the last layer into the 1x1 weight.
    w3 = (w.reshape(c, 3).T * scale.reshape(3, 1)).astype(jnp.float32)   # (3, C)
    b3 = bias.reshape(3, 1).astype(jnp.float32)

    out = pl.pallas_call(
        _fuse_kernel,
        grid=(nt,),
        in_specs=[_mtile(c, tm), _resident((3, c)), _resident((3, 1)),
                  _mtile(c, tm), _mtile(c, tm), _mtile(c, tm)],
        out_specs=_mtile(c, tm),
        out_shape=jax.ShapeDtypeStruct((c, l_out), jnp.float32),
        compiler_params=_PARALLEL,
    )(flat(a), w3, b3, flat(l3), flat(m1), flat(s3))
    return out[:, :m].reshape(c, n, h, wd)


def nearest_resize(x, size):
    """cus_sample(mode='size'): F.interpolate(..., mode='nearest') on axes 2, 3."""
    th, tw = size
    h, w = x.shape[2], x.shape[3]
    ih = (jnp.arange(th) * h) // th
    iw = (jnp.arange(tw) * w) // tw
    return x[:, :, ih][:, :, :, iw]


# ----------------------------------------------------------------------------
# SIU forward (Pallas version)
# ----------------------------------------------------------------------------

def siu_forward(params, l, m, s):
    """l, m, s: NCHW (like the PyTorch module).  Returns NCHW at m's scale."""
    tgt = (m.shape[2], m.shape[3])
    # Channels-first internal layout: one cheap leading-axes swap per boundary array.
    lc = jnp.transpose(l, (1, 0, 2, 3))
    mc = jnp.transpose(m, (1, 0, 2, 3))
    sc = jnp.transpose(s, (1, 0, 2, 3))

    l1 = conv_bn_act(lc, *params["conv_l_pre_down"])
    l2 = pool_max_plus_avg(l1, tgt)
    l3 = conv_bn_act(l2, *params["conv_l_post_down"])
    m1 = conv_bn_act(mc, *params["conv_m"])
    s1 = conv_bn_act(sc, *params["conv_s_pre_up"])
    s2 = nearest_resize(s1, tgt)
    s3 = conv_bn_act(s2, *params["conv_s_post_up"])

    a = trans0_fused(l3, m1, s3, *params["trans0"])   # concat + 1x1 ConvBNReLU, fused
    a = conv_bn_act(a, *params["trans1"])
    a = conv_bn_act(a, *params["trans2"])
    out = fuse(a, params["trans3"], l3, m1, s3)       # 1x1 conv + softmax + sum, fused
    return jnp.transpose(out, (1, 0, 2, 3))           # back to NCHW


# ----------------------------------------------------------------------------
# Deterministic parameter init (synthetic; BN folded into scale/bias)
# ----------------------------------------------------------------------------

def _init_convbn(key, cin, cout, k):
    k1, k2, k3 = jax.random.split(key, 3)
    w = jax.random.normal(k1, (k, k, cin, cout), jnp.float32) / np.sqrt(k * k * cin)
    scale = 1.0 + 0.1 * jax.random.normal(k2, (cout,), jnp.float32)
    bias = 0.1 * jax.random.normal(k3, (cout,), jnp.float32)
    return (w, scale, bias)


def init_params(key, c):
    ks = jax.random.split(key, 10)
    p = {
        "conv_l_pre_down": _init_convbn(ks[0], c, c, 5),
        "conv_l_post_down": _init_convbn(ks[1], c, c, 3),
        "conv_m": _init_convbn(ks[2], c, c, 3),
        "conv_s_pre_up": _init_convbn(ks[3], c, c, 3),
        "conv_s_post_up": _init_convbn(ks[4], c, c, 3),
        "trans0": _init_convbn(ks[5], 3 * c, c, 1),
        "trans1": _init_convbn(ks[6], c, c, 3),
        "trans2": _init_convbn(ks[7], c, c, 3),
    }
    w_last = jax.random.normal(ks[8], (1, 1, c, 3), jnp.float32) / np.sqrt(c)
    b_last = 0.1 * jax.random.normal(ks[9], (3,), jnp.float32)
    p["trans3"] = (w_last, jnp.ones((3,), jnp.float32), b_last)   # plain conv + bias
    return p


# ----------------------------------------------------------------------------
# Pure-JAX reference (sanity check of the Pallas path)
# ----------------------------------------------------------------------------

def _conv_ref(x, w, scale, bias, relu=True):
    pad = w.shape[0] // 2
    y = jax.lax.conv_general_dilated(
        x, w, window_strides=(1, 1), padding=[(pad, pad), (pad, pad)],
        dimension_numbers=("NCHW", "HWIO", "NCHW"))
    y = y * scale.reshape(1, -1, 1, 1) + bias.reshape(1, -1, 1, 1)
    return jnp.maximum(y, 0.0) if relu else y


def _pool_ref(x, size):
    n, c, h, w = x.shape
    th, tw = size
    rh, rw = h // th, w // tw
    xr = x.reshape(n, c, th, rh, tw, rw)
    return xr.max(axis=(3, 5)) + xr.mean(axis=(3, 5))


def siu_ref(params, l, m, s):
    tgt = (m.shape[2], m.shape[3])
    l1 = _conv_ref(l, *params["conv_l_pre_down"])
    l3 = _conv_ref(_pool_ref(l1, tgt), *params["conv_l_post_down"])
    m1 = _conv_ref(m, *params["conv_m"])
    s1 = _conv_ref(s, *params["conv_s_pre_up"])
    s3 = _conv_ref(nearest_resize(s1, tgt), *params["conv_s_post_up"])
    x = jnp.concatenate([l3, m1, s3], axis=1)
    a = _conv_ref(x, *params["trans0"])
    a = _conv_ref(a, *params["trans1"])
    a = _conv_ref(a, *params["trans2"])
    attn = _conv_ref(a, *params["trans3"], relu=False)
    wgt = jax.nn.softmax(attn, axis=1)
    return wgt[:, 0:1] * l3 + wgt[:, 1:2] * m1 + wgt[:, 2:3] * s3


# ----------------------------------------------------------------------------

if __name__ == "__main__":
    key = jax.random.PRNGKey(0)
    kp, kl, km, ks = jax.random.split(key, 4)

    C, N, Hm, Wm = 8, 2, 16, 16
    params = init_params(kp, C)
    l = jax.random.normal(kl, (N, C, 2 * Hm, 2 * Wm), jnp.float32)    # large scale
    m = jax.random.normal(km, (N, C, Hm, Wm), jnp.float32)            # target scale
    s = jax.random.normal(ks, (N, C, Hm // 2, Wm // 2), jnp.float32)  # small scale

    out = jax.jit(siu_forward)(params, l, m, s)
    out = jax.block_until_ready(out)
    assert out.shape == (N, C, Hm, Wm)

    ref = siu_ref(params, l, m, s)
    np.testing.assert_allclose(np.asarray(out), np.asarray(ref), rtol=5e-2, atol=5e-2)

    print("KERNEL_OK")
</pallas_src>

<mosaic_0001>
module attributes {stable_mosaic.version = 11 : i64} {
  func.func @_conv_mm_kernel(%arg0: i32, %arg1: memref<1x8x660xf32, #tpu.memory_space<vmem>>, %arg2: memref<8x200xf32, #tpu.memory_space<vmem>>, %arg3: memref<8x1xf32, #tpu.memory_space<vmem>>, %arg4: memref<8x1xf32, #tpu.memory_space<vmem>>, %arg5: memref<8x512xf32, #tpu.memory_space<vmem>>, %arg6: memref<200x512xf32, #tpu.memory_space<vmem>>) attributes {dimension_semantics = [#tpu.dimension_semantics<parallel>], iteration_bounds = array<i64: 6>, scalar_prefetch = 0 : i64, scratch_operands = 1 : i64, tpu.core_type = #tpu.core_type<tc>, window_params = [{transform_indices = @transform_0, window_bounds = array<i64: 1, 8, 660>}, {pipeline_mode = #tpu.pipeline_mode<synchronous>, transform_indices = @transform_1, window_bounds = array<i64: 8, 200>}, {pipeline_mode = #tpu.pipeline_mode<synchronous>, transform_indices = @transform_2, window_bounds = array<i64: 8, 1>}, {pipeline_mode = #tpu.pipeline_mode<synchronous>, transform_indices = @transform_3, window_bounds = array<i64: 8, 1>}, {transform_indices = @transform_4, window_bounds = array<i64: 8, 512>}]} {
    %c0 = arith.constant 0 : index
    %c0_0 = arith.constant 0 : index
    %c0_1 = arith.constant 0 : index
    %0 = vector.load %arg1[%c0, %c0_0, %c0_1] : memref<1x8x660xf32, #tpu.memory_space<vmem>>, vector<1x8x660xf32>
    %1 = vector.shape_cast %0 : vector<1x8x660xf32> to vector<8x660xf32>
    %2 = vector.extract_strided_slice %1 {offsets = [0, 0], sizes = [8, 512], strides = [1, 1]} : vector<8x660xf32> to vector<8x512xf32>
    %c0_2 = arith.constant 0 : index
    %c0_3 = arith.constant 0 : index
    %3 = vector.load %arg6[%c0_2, %c0_3] : memref<200x512xf32, #tpu.memory_space<vmem>>, vector<8x512xf32>
    tpu.vector_store %arg6[%c0_2, %c0_3], %2 {strides = array<i32>} : memref<200x512xf32, #tpu.memory_space<vmem>>, vector<8x512xf32>,
    %4 = vector.extract_strided_slice %1 {offsets = [0, 1], sizes = [8, 512], strides = [1, 1]} : vector<8x660xf32> to vector<8x512xf32>
    %c8 = arith.constant 8 : index
    %c0_4 = arith.constant 0 : index
    %5 = vector.load %arg6[%c8, %c0_4] : memref<200x512xf32, #tpu.memory_space<vmem>>, vector<8x512xf32>
    tpu.vector_store %arg6[%c8, %c0_4], %4 {strides = array<i32>} : memref<200x512xf32, #tpu.memory_space<vmem>>, vector<8x512xf32>,
    %6 = vector.extract_strided_slice %1 {offsets = [0, 2], sizes = [8, 512], strides = [1, 1]} : vector<8x660xf32> to vector<8x512xf32>
    %c16 = arith.constant 16 : index
    %c0_5 = arith.constant 0 : index
    %7 = vector.load %arg6[%c16, %c0_5] : memref<200x512xf32, #tpu.memory_space<vmem>>, vector<8x512xf32>
    tpu.vector_store %arg6[%c16, %c0_5], %6 {strides = array<i32>} : memref<200x512xf32, #tpu.memory_space<vmem>>, vector<8x512xf32>,
    %8 = vector.extract_strided_slice %1 {offsets = [0, 3], sizes = [8, 512], strides = [1, 1]} : vector<8x660xf32> to vector<8x512xf32>
    %c24 = arith.constant 24 : index
    %c0_6 = arith.constant 0 : index
    %9 = vector.load %arg6[%c24, %c0_6] : memref<200x512xf32, #tpu.memory_space<vmem>>, vector<8x512xf32>
    tpu.vector_store %arg6[%c24, %c0_6], %8 {strides = array<i32>} : memref<200x512xf32, #tpu.memory_space<vmem>>, vector<8x512xf32>,
    %10 = vector.extract_strided_slice %1 {offsets = [0, 4], sizes = [8, 512], strides = [1, 1]} : vector<8x660xf32> to vector<8x512xf32>
    %c32 = arith.constant 32 : index
    %c0_7 = arith.constant 0 : index
    %11 = vector.load %arg6[%c32, %c0_7] : memref<200x512xf32, #tpu.memory_space<vmem>>, vector<8x512xf32>
    tpu.vector_store %arg6[%c32, %c0_7], %10 {strides = array<i32>} : memref<200x512xf32, #tpu.memory_space<vmem>>, vector<8x512xf32>,
    %12 = vector.extract_strided_slice %1 {offsets = [0, 36], sizes = [8, 512], strides = [1, 1]} : vector<8x660xf32> to vector<8x512xf32>
    %c40 = arith.constant 40 : index
    %c0_8 = arith.constant 0 : index
    %13 = vector.load %arg6[%c40, %c0_8] : memref<200x512xf32, #tpu.memory_space<vmem>>, vector<8x512xf32>
    tpu.vector_store %arg6[%c40, %c0_8], %12 {strides = array<i32>} : memref<200x512xf32, #tpu.memory_space<vmem>>, vector<8x512xf32>,
    %14 = vector.extract_strided_slice %1 {offsets = [0, 37], sizes = [8, 512], strides = [1, 1]} : vector<8x660xf32> to vector<8x512xf32>
    %c48 = arith.constant 48 : index
    %c0_9 = arith.constant 0 : index
    %15 = vector.load %arg6[%c48, %c0_9] : memref<200x512xf32, #tpu.memory_space<vmem>>, vector<8x512xf32>
    tpu.vector_store %arg6[%c48, %c0_9], %14 {strides = array<i32>} : memref<200x512xf32, #tpu.memory_space<vmem>>, vector<8x512xf32>,
    %16 = vector.extract_strided_slice %1 {offsets = [0, 38], sizes = [8, 512], strides = [1, 1]} : vector<8x660xf32> to vector<8x512xf32>
    %c56 = arith.constant 56 : index
    %c0_10 = arith.constant 0 : index
    %17 = vector.load %arg6[%c56, %c0_10] : memref<200x512xf32, #tpu.memory_space<vmem>>, vector<8x512xf32>
    tpu.vector_store %arg6[%c56, %c0_10], %16 {strides = array<i32>} : memref<200x512xf32, #tpu.memory_space<vmem>>, vector<8x512xf32>,
    %18 = vector.extract_strided_slice %1 {offsets = [0, 39], sizes = [8, 512], strides = [1, 1]} : vector<8x660xf32> to vector<8x512xf32>
    %c64 = arith.constant 64 : index
    %c0_11 = arith.constant 0 : index
    %19 = vector.load %arg6[%c64, %c0_11] : memref<200x512xf32, #tpu.memory_space<vmem>>, vector<8x512xf32>
    tpu.vector_store %arg6[%c64, %c0_11], %18 {strides = array<i32>} : memref<200x512xf32, #tpu.memory_space<vmem>>, vector<8x512xf32>,
    %20 = vector.extract_strided_slice %1 {offsets = [0, 40], sizes = [8, 512], strides = [1, 1]} : vector<8x660xf32> to vector<8x512xf32>
    %c72 = arith.constant 72 : index
    %c0_12 = arith.constant 0 : index
    %21 = vector.load %arg6[%c72, %c0_12] : memref<200x512xf32, #tpu.memory_space<vmem>>, vector<8x512xf32>
    tpu.vector_store %arg6[%c72, %c0_12], %20 {strides = array<i32>} : memref<200x512xf32, #tpu.memory_space<vmem>>, vector<8x512xf32>,
    %22 = vector.extract_strided_slice %1 {offsets = [0, 72], sizes = [8, 512], strides = [1, 1]} : vector<8x660xf32> to vector<8x512xf32>
    %c80 = arith.constant 80 : index
    %c0_13 = arith.constant 0 : index
    %23 = vector.load %arg6[%c80, %c0_13] : memref<200x512xf32, #tpu.memory_space<vmem>>, vector<8x512xf32>
    tpu.vector_store %arg6[%c80, %c0_13], %22 {strides = array<i32>} : memref<200x512xf32, #tpu.memory_space<vmem>>, vector<8x512xf32>,
    %24 = vector.extract_strided_slice %1 {offsets = [0, 73], sizes = [8, 512], strides = [1, 1]} : vector<8x660xf32> to vector<8x512xf32>
    %c88 = arith.constant 88 : index
    %c0_14 = arith.constant 0 : index
    %25 = vector.load %arg6[%c88, %c0_14] : memref<200x512xf32, #tpu.memory_space<vmem>>, vector<8x512xf32>
    tpu.vector_store %arg6[%c88, %c0_14], %24 {strides = array<i32>} : memref<200x512xf32, #tpu.memory_space<vmem>>, vector<8x512xf32>,
    %26 = vector.extract_strided_slice %1 {offsets = [0, 74], sizes = [8, 512], strides = [1, 1]} : vector<8x660xf32> to vector<8x512xf32>
    %c96 = arith.constant 96 : index
    %c0_15 = arith.constant 0 : index
    %27 = vector.load %arg6[%c96, %c0_15] : memref<200x512xf32, #tpu.memory_space<vmem>>, vector<8x512xf32>
    tpu.vector_store %arg6[%c96, %c0_15], %26 {strides = array<i32>} : memref<200x512xf32, #tpu.memory_space<vmem>>, vector<8x512xf32>,
    %28 = vector.extract_strided_slice %1 {offsets = [0, 75], sizes = [8, 512], strides = [1, 1]} : vector<8x660xf32> to vector<8x512xf32>
    %c104 = arith.constant 104 : index
    %c0_16 = arith.constant 0 : index
    %29 = vector.load %arg6[%c104, %c0_16] : memref<200x512xf32, #tpu.memory_space<vmem>>, vector<8x512xf32>
    tpu.vector_store %arg6[%c104, %c0_16], %28 {strides = array<i32>} : memref<200x512xf32, #tpu.memory_space<vmem>>, vector<8x512xf32>,
    %30 = vector.extract_strided_slice %1 {offsets = [0, 76], sizes = [8, 512], strides = [1, 1]} : vector<8x660xf32> to vector<8x512xf32>
    %c112 = arith.constant 112 : index
    %c0_17 = arith.constant 0 : index
    %31 = vector.load %arg6[%c112, %c0_17] : memref<200x512xf32, #tpu.memory_space<vmem>>, vector<8x512xf32>
    tpu.vector_store %arg6[%c112, %c0_17], %30 {strides = array<i32>} : memref<200x512xf32, #tpu.memory_space<vmem>>, vector<8x512xf32>,
    %32 = vector.extract_strided_slice %1 {offsets = [0, 108], sizes = [8, 512], strides = [1, 1]} : vector<8x660xf32> to vector<8x512xf32>
    %c120 = arith.constant 120 : index
    %c0_18 = arith.constant 0 : index
    %33 = vector.load %arg6[%c120, %c0_18] : memref<200x512xf32, #tpu.memory_space<vmem>>, vector<8x512xf32>
    tpu.vector_store %arg6[%c120, %c0_18], %32 {strides = array<i32>} : memref<200x512xf32, #tpu.memory_space<vmem>>, vector<8x512xf32>,
    %34 = vector.extract_strided_slice %1 {offsets = [0, 109], sizes = [8, 512], strides = [1, 1]} : vector<8x660xf32> to vector<8x512xf32>
    %c128 = arith.constant 128 : index
    %c0_19 = arith.constant 0 : index
    %35 = vector.load %arg6[%c128, %c0_19] : memref<200x512xf32, #tpu.memory_space<vmem>>, vector<8x512xf32>
    tpu.vector_store %arg6[%c128, %c0_19], %34 {strides = array<i32>} : memref<200x512xf32, #tpu.memory_space<vmem>>, vector<8x512xf32>,
    %36 = vector.extract_strided_slice %1 {offsets = [0, 110], sizes = [8, 512], strides = [1, 1]} : vector<8x660xf32> to vector<8x512xf32>
    %c136 = arith.constant 136 : index
    %c0_20 = arith.constant 0 : index
    %37 = vector.load %arg6[%c136, %c0_20] : memref<200x512xf32, #tpu.memory_space<vmem>>, vector<8x512xf32>
    tpu.vector_store %arg6[%c136, %c0_20], %36 {strides = array<i32>} : memref<200x512xf32, #tpu.memory_space<vmem>>, vector<8x512xf32>,
    %38 = vector.extract_strided_slice %1 {offsets = [0, 111], sizes = [8, 512], strides = [1, 1]} : vector<8x660xf32> to vector<8x512xf32>
    %c144 = arith.constant 144 : index
    %c0_21 = arith.constant 0 : index
    %39 = vector.load %arg6[%c144, %c0_21] : memref<200x512xf32, #tpu.memory_space<vmem>>, vector<8x512xf32>
    tpu.vector_store %arg6[%c144, %c0_21], %38 {strides = array<i32>} : memref<200x512xf32, #tpu.memory_space<vmem>>, vector<8x512xf32>,
    %40 = vector.extract_strided_slice %1 {offsets = [0, 112], sizes = [8, 512], strides = [1, 1]} : vector<8x660xf32> to vector<8x512xf32>
    %c152 = arith.constant 152 : index
    %c0_22 = arith.constant 0 : index
    %41 = vector.load %arg6[%c152, %c0_22] : memref<200x512xf32, #tpu.memory_space<vmem>>, vector<8x512xf32>
    tpu.vector_store %arg6[%c152, %c0_22], %40 {strides = array<i32>} : memref<200x512xf32, #tpu.memory_space<vmem>>, vector<8x512xf32>,
    %42 = vector.extract_strided_slice %1 {offsets = [0, 144], sizes = [8, 512], strides = [1, 1]} : vector<8x660xf32> to vector<8x512xf32>
    %c160 = arith.constant 160 : index
    %c0_23 = arith.constant 0 : index
    %43 = vector.load %arg6[%c160, %c0_23] : memref<200x512xf32, #tpu.memory_space<vmem>>, vector<8x512xf32>
    tpu.vector_store %arg6[%c160, %c0_23], %42 {strides = array<i32>} : memref<200x512xf32, #tpu.memory_space<vmem>>, vector<8x512xf32>,
    %44 = vector.extract_strided_slice %1 {offsets = [0, 145], sizes = [8, 512], strides = [1, 1]} : vector<8x660xf32> to vector<8x512xf32>
    %c168 = arith.constant 168 : index
    %c0_24 = arith.constant 0 : index
    %45 = vector.load %arg6[%c168, %c0_24] : memref<200x512xf32, #tpu.memory_space<vmem>>, vector<8x512xf32>
    tpu.vector_store %arg6[%c168, %c0_24], %44 {strides = array<i32>} : memref<200x512xf32, #tpu.memory_space<vmem>>, vector<8x512xf32>,
    %46 = vector.extract_strided_slice %1 {offsets = [0, 146], sizes = [8, 512], strides = [1, 1]} : vector<8x660xf32> to vector<8x512xf32>
    %c176 = arith.constant 176 : index
    %c0_25 = arith.constant 0 : index
    %47 = vector.load %arg6[%c176, %c0_25] : memref<200x512xf32, #tpu.memory_space<vmem>>, vector<8x512xf32>
    tpu.vector_store %arg6[%c176, %c0_25], %46 {strides = array<i32>} : memref<200x512xf32, #tpu.memory_space<vmem>>, vector<8x512xf32>,
    %48 = vector.extract_strided_slice %1 {offsets = [0, 147], sizes = [8, 512], strides = [1, 1]} : vector<8x660xf32> to vector<8x512xf32>
    %c184 = arith.constant 184 : index
    %c0_26 = arith.constant 0 : index
    %49 = vector.load %arg6[%c184, %c0_26] : memref<200x512xf32, #tpu.memory_space<vmem>>, vector<8x512xf32>
    tpu.vector_store %arg6[%c184, %c0_26], %48 {strides = array<i32>} : memref<200x512xf32, #tpu.memory_space<vmem>>, vector<8x512xf32>,
    %50 = vector.extract_strided_slice %1 {offsets = [0, 148], sizes = [8, 512], strides = [1, 1]} : vector<8x660xf32> to vector<8x512xf32>
    %c192 = arith.constant 192 : index
    %c0_27 = arith.constant 0 : index
    %51 = vector.load %arg6[%c192, %c0_27] : memref<200x512xf32, #tpu.memory_space<vmem>>, vector<8x512xf32>
    tpu.vector_store %arg6[%c192, %c0_27], %50 {strides = array<i32>} : memref<200x512xf32, #tpu.memory_space<vmem>>, vector<8x512xf32>,
    %c0_28 = arith.constant 0 : index
    %c0_29 = arith.constant 0 : index
    %52 = vector.load %arg2[%c0_28, %c0_29] : memref<8x200xf32, #tpu.memory_space<vmem>>, vector<8x200xf32>
    %c0_30 = arith.constant 0 : index
    %c0_31 = arith.constant 0 : index
    %53 = vector.load %arg6[%c0_30, %c0_31] : memref<200x512xf32, #tpu.memory_space<vmem>>, vector<200x512xf32>
    %cst = arith.constant dense<0.000000e+00> : vector<8x512xf32>
    %54 = tpu.matmul %52, %53, %cst {dimension_numbers = #tpu.dot_dimension_numbers<[1], [0], [0], [1], [0, 0, 1, 1], [], []>} : vector<8x200xf32>, vector<200x512xf32>, vector<8x512xf32> -> vector<8x512xf32>
    %c0_32 = arith.constant 0 : index
    %c0_33 = arith.constant 0 : index
    %55 = vector.load %arg3[%c0_32, %c0_33] : memref<8x1xf32, #tpu.memory_space<vmem>>, vector<8x1xf32>
    %56 = vector.broadcast %55 : vector<8x1xf32> to vector<8x512xf32>
    %57 = arith.mulf %54, %56 : vector<8x512xf32>
    %c0_34 = arith.constant 0 : index
    %c0_35 = arith.constant 0 : index
    %58 = vector.load %arg4[%c0_34, %c0_35] : memref<8x1xf32, #tpu.memory_space<vmem>>, vector<8x1xf32>
    %59 = vector.broadcast %58 : vector<8x1xf32> to vector<8x512xf32>
    %60 = arith.addf %57, %59 : vector<8x512xf32>
    %cst_36 = arith.constant 0.000000e+00 : f32
    %61 = vector.broadcast %cst_36 : f32 to vector<8x512xf32>
    %62 = arith.maximumf %60, %61 : vector<8x512xf32>
    %c0_37 = arith.constant 0 : index
    %c0_38 = arith.constant 0 : index
    %63 = vector.load %arg5[%c0_37, %c0_38] : memref<8x512xf32, #tpu.memory_space<vmem>>, vector<8x512xf32>
    tpu.vector_store %arg5[%c0_37, %c0_38], %62 {strides = array<i32>} : memref<8x512xf32, #tpu.memory_space<vmem>>, vector<8x512xf32>,
    return
  }
  func.func @transform_0(%arg0: i32) -> (i32, i32, i32) {
    %c0_i32 = arith.constant 0 : i32
    %c0_i32_0 = arith.constant 0 : i32
    %c0_i32_1 = arith.constant 0 : i32
    return %arg0, %c0_i32, %c0_i32_0 : i32, i32, i32
  }
  func.func @transform_1(%arg0: i32) -> (i32, i32) {
    %c0_i32 = arith.constant 0 : i32
    %c0_i32_0 = arith.constant 0 : i32
    %c0_i32_1 = arith.constant 0 : i32
    return %c0_i32, %c0_i32_0 : i32, i32
  }
  func.func @transform_2(%arg0: i32) -> (i32, i32) {
    %c0_i32 = arith.constant 0 : i32
    %c0_i32_0 = arith.constant 0 : i32
    %c0_i32_1 = arith.constant 0 : i32
    return %c0_i32, %c0_i32_0 : i32, i32
  }
  func.func @transform_3(%arg0: i32) -> (i32, i32) {
    %c0_i32 = arith.constant 0 : i32
    %c0_i32_0 = arith.constant 0 : i32
    %c0_i32_1 = arith.constant 0 : i32
    return %c0_i32, %c0_i32_0 : i32, i32
  }
  func.func @transform_4(%arg0: i32) -> (i32, i32) {
    %c0_i32 = arith.constant 0 : i32
    %c0_i32_0 = arith.constant 0 : i32
    return %c0_i32, %arg0 : i32, i32
  }
}

module attributes {stable_mosaic.version = 11 : i64} {
  func.func @_pool_kernel(%arg0: i32, %arg1: memref<4x8x512xf32, #tpu.memory_space<vmem>>, %arg2: memref<8x512xf32, #tpu.memory_space<vmem>>) attributes {dimension_semantics = [#tpu.dimension_semantics<parallel>], iteration_bounds = array<i64: 1>, scalar_prefetch = 0 : i64, scratch_operands = 0 : i64, tpu.core_type = #tpu.core_type<tc>, window_params = [{transform_indices = @transform_0, window_bounds = array<i64: 4, 8, 512>}, {transform_indices = @transform_1, window_bounds = array<i64: 8, 512>}]} {
    %c0 = arith.constant 0 : index
    %c0_0 = arith.constant 0 : index
    %c0_1 = arith.constant 0 : index
    %0 = vector.load %arg1[%c0, %c0_0, %c0_1] : memref<4x8x512xf32, #tpu.memory_space<vmem>>, vector<4x8x512xf32>
    %cst = arith.constant dense<0xFF800000> : vector<8x512xf32>
    %1 = vector.multi_reduction <maximumf>, %0, %cst [0] : vector<4x8x512xf32> to vector<8x512xf32>
    %cst_2 = arith.constant dense<0.000000e+00> : vector<8x512xf32>
    %2 = vector.multi_reduction <add>, %0, %cst_2 [0] : vector<4x8x512xf32> to vector<8x512xf32>
    %cst_3 = arith.constant 2.500000e-01 : f32
    %3 = vector.broadcast %cst_3 : f32 to vector<8x512xf32>
    %4 = arith.mulf %2, %3 : vector<8x512xf32>
    %5 = arith.addf %1, %4 : vector<8x512xf32>
    %c0_4 = arith.constant 0 : index
    %c0_5 = arith.constant 0 : index
    %6 = vector.load %arg2[%c0_4, %c0_5] : memref<8x512xf32, #tpu.memory_space<vmem>>, vector<8x512xf32>
    tpu.vector_store %arg2[%c0_4, %c0_5], %5 {strides = array<i32>} : memref<8x512xf32, #tpu.memory_space<vmem>>, vector<8x512xf32>,
    return
  }
  func.func @transform_0(%arg0: i32) -> (i32, i32, i32) {
    %c0_i32 = arith.constant 0 : i32
    %c0_i32_0 = arith.constant 0 : i32
    %c0_i32_1 = arith.constant 0 : i32
    return %c0_i32, %c0_i32_0, %arg0 : i32, i32, i32
  }
  func.func @transform_1(%arg0: i32) -> (i32, i32) {
    %c0_i32 = arith.constant 0 : i32
    %c0_i32_0 = arith.constant 0 : i32
    return %c0_i32, %arg0 : i32, i32
  }
}

module attributes {stable_mosaic.version = 11 : i64} {
  func.func @_conv_mm_kernel(%arg0: i32, %arg1: memref<1x8x550xf32, #tpu.memory_space<vmem>>, %arg2: memref<8x72xf32, #tpu.memory_space<vmem>>, %arg3: memref<8x1xf32, #tpu.memory_space<vmem>>, %arg4: memref<8x1xf32, #tpu.memory_space<vmem>>, %arg5: memref<8x512xf32, #tpu.memory_space<vmem>>, %arg6: memref<72x512xf32, #tpu.memory_space<vmem>>) attributes {dimension_semantics = [#tpu.dimension_semantics<parallel>], iteration_bounds = array<i64: 2>, scalar_prefetch = 0 : i64, scratch_operands = 1 : i64, tpu.core_type = #tpu.core_type<tc>, window_params = [{transform_indices = @transform_0, window_bounds = array<i64: 1, 8, 550>}, {pipeline_mode = #tpu.pipeline_mode<synchronous>, transform_indices = @transform_1, window_bounds = array<i64: 8, 72>}, {pipeline_mode = #tpu.pipeline_mode<synchronous>, transform_indices = @transform_2, window_bounds = array<i64: 8, 1>}, {pipeline_mode = #tpu.pipeline_mode<synchronous>, transform_indices = @transform_3, window_bounds = array<i64: 8, 1>}, {transform_indices = @transform_4, window_bounds = array<i64: 8, 512>}]} {
    %c0 = arith.constant 0 : index
    %c0_0 = arith.constant 0 : index
    %c0_1 = arith.constant 0 : index
    %0 = vector.load %arg1[%c0, %c0_0, %c0_1] : memref<1x8x550xf32, #tpu.memory_space<vmem>>, vector<1x8x550xf32>
    %1 = vector.shape_cast %0 : vector<1x8x550xf32> to vector<8x550xf32>
    %2 = vector.extract_strided_slice %1 {offsets = [0, 0], sizes = [8, 512], strides = [1, 1]} : vector<8x550xf32> to vector<8x512xf32>
    %c0_2 = arith.constant 0 : index
    %c0_3 = arith.constant 0 : index
    %3 = vector.load %arg6[%c0_2, %c0_3] : memref<72x512xf32, #tpu.memory_space<vmem>>, vector<8x512xf32>
    tpu.vector_store %arg6[%c0_2, %c0_3], %2 {strides = array<i32>} : memref<72x512xf32, #tpu.memory_space<vmem>>, vector<8x512xf32>,
    %4 = vector.extract_strided_slice %1 {offsets = [0, 1], sizes = [8, 512], strides = [1, 1]} : vector<8x550xf32> to vector<8x512xf32>
    %c8 = arith.constant 8 : index
    %c0_4 = arith.constant 0 : index
    %5 = vector.load %arg6[%c8, %c0_4] : memref<72x512xf32, #tpu.memory_space<vmem>>, vector<8x512xf32>
    tpu.vector_store %arg6[%c8, %c0_4], %4 {strides = array<i32>} : memref<72x512xf32, #tpu.memory_space<vmem>>, vector<8x512xf32>,
    %6 = vector.extract_strided_slice %1 {offsets = [0, 2], sizes = [8, 512], strides = [1, 1]} : vector<8x550xf32> to vector<8x512xf32>
    %c16 = arith.constant 16 : index
    %c0_5 = arith.constant 0 : index
    %7 = vector.load %arg6[%c16, %c0_5] : memref<72x512xf32, #tpu.memory_space<vmem>>, vector<8x512xf32>
    tpu.vector_store %arg6[%c16, %c0_5], %6 {strides = array<i32>} : memref<72x512xf32, #tpu.memory_space<vmem>>, vector<8x512xf32>,
    %8 = vector.extract_strided_slice %1 {offsets = [0, 18], sizes = [8, 512], strides = [1, 1]} : vector<8x550xf32> to vector<8x512xf32>
    %c24 = arith.constant 24 : index
    %c0_6 = arith.constant 0 : index
    %9 = vector.load %arg6[%c24, %c0_6] : memref<72x512xf32, #tpu.memory_space<vmem>>, vector<8x512xf32>
    tpu.vector_store %arg6[%c24, %c0_6], %8 {strides = array<i32>} : memref<72x512xf32, #tpu.memory_space<vmem>>, vector<8x512xf32>,
    %10 = vector.extract_strided_slice %1 {offsets = [0, 19], sizes = [8, 512], strides = [1, 1]} : vector<8x550xf32> to vector<8x512xf32>
    %c32 = arith.constant 32 : index
    %c0_7 = arith.constant 0 : index
    %11 = vector.load %arg6[%c32, %c0_7] : memref<72x512xf32, #tpu.memory_space<vmem>>, vector<8x512xf32>
    tpu.vector_store %arg6[%c32, %c0_7], %10 {strides = array<i32>} : memref<72x512xf32, #tpu.memory_space<vmem>>, vector<8x512xf32>,
    %12 = vector.extract_strided_slice %1 {offsets = [0, 20], sizes = [8, 512], strides = [1, 1]} : vector<8x550xf32> to vector<8x512xf32>
    %c40 = arith.constant 40 : index
    %c0_8 = arith.constant 0 : index
    %13 = vector.load %arg6[%c40, %c0_8] : memref<72x512xf32, #tpu.memory_space<vmem>>, vector<8x512xf32>
    tpu.vector_store %arg6[%c40, %c0_8], %12 {strides = array<i32>} : memref<72x512xf32, #tpu.memory_space<vmem>>, vector<8x512xf32>,
    %14 = vector.extract_strided_slice %1 {offsets = [0, 36], sizes = [8, 512], strides = [1, 1]} : vector<8x550xf32> to vector<8x512xf32>
    %c48 = arith.constant 48 : index
    %c0_9 = arith.constant 0 : index
    %15 = vector.load %arg6[%c48, %c0_9] : memref<72x512xf32, #tpu.memory_space<vmem>>, vector<8x512xf32>
    tpu.vector_store %arg6[%c48, %c0_9], %14 {strides = array<i32>} : memref<72x512xf32, #tpu.memory_space<vmem>>, vector<8x512xf32>,
    %16 = vector.extract_strided_slice %1 {offsets = [0, 37], sizes = [8, 512], strides = [1, 1]} : vector<8x550xf32> to vector<8x512xf32>
    %c56 = arith.constant 56 : index
    %c0_10 = arith.constant 0 : index
    %17 = vector.load %arg6[%c56, %c0_10] : memref<72x512xf32, #tpu.memory_space<vmem>>, vector<8x512xf32>
    tpu.vector_store %arg6[%c56, %c0_10], %16 {strides = array<i32>} : memref<72x512xf32, #tpu.memory_space<vmem>>, vector<8x512xf32>,
    %18 = vector.extract_strided_slice %1 {offsets = [0, 38], sizes = [8, 512], strides = [1, 1]} : vector<8x550xf32> to vector<8x512xf32>
    %c64 = arith.constant 64 : index
    %c0_11 = arith.constant 0 : index
    %19 = vector.load %arg6[%c64, %c0_11] : memref<72x512xf32, #tpu.memory_space<vmem>>, vector<8x512xf32>
    tpu.vector_store %arg6[%c64, %c0_11], %18 {strides = array<i32>} : memref<72x512xf32, #tpu.memory_space<vmem>>, vector<8x512xf32>,
    %c0_12 = arith.constant 0 : index
    %c0_13 = arith.constant 0 : index
    %20 = vector.load %arg2[%c0_12, %c0_13] : memref<8x72xf32, #tpu.memory_space<vmem>>, vector<8x72xf32>
    %c0_14 = arith.constant 0 : index
    %c0_15 = arith.constant 0 : index
    %21 = vector.load %arg6[%c0_14, %c0_15] : memref<72x512xf32, #tpu.memory_space<vmem>>, vector<72x512xf32>
    %cst = arith.constant dense<0.000000e+00> : vector<8x512xf32>
    %22 = tpu.matmul %20, %21, %cst {dimension_numbers = #tpu.dot_dimension_numbers<[1], [0], [0], [1], [0, 0, 1, 1], [], []>} : vector<8x72xf32>, vector<72x512xf32>, vector<8x512xf32> -> vector<8x512xf32>
    %c0_16 = arith.constant 0 : index
    %c0_17 = arith.constant 0 : index
    %23 = vector.load %arg3[%c0_16, %c0_17] : memref<8x1xf32, #tpu.memory_space<vmem>>, vector<8x1xf32>
    %24 = vector.broadcast %23 : vector<8x1xf32> to vector<8x512xf32>
    %25 = arith.mulf %22, %24 : vector<8x512xf32>
    %c0_18 = arith.constant 0 : index
    %c0_19 = arith.constant 0 : index
    %26 = vector.load %arg4[%c0_18, %c0_19] : memref<8x1xf32, #tpu.memory_space<vmem>>, vector<8x1xf32>
    %27 = vector.broadcast %26 : vector<8x1xf32> to vector<8x512xf32>
    %28 = arith.addf %25, %27 : vector<8x512xf32>
    %cst_20 = arith.constant 0.000000e+00 : f32
    %29 = vector.broadcast %cst_20 : f32 to vector<8x512xf32>
    %30 = arith.maximumf %28, %29 : vector<8x512xf32>
    %c0_21 = arith.constant 0 : index
    %c0_22 = arith.constant 0 : index
    %31 = vector.load %arg5[%c0_21, %c0_22] : memref<8x512xf32, #tpu.memory_space<vmem>>, vector<8x512xf32>
    tpu.vector_store %arg5[%c0_21, %c0_22], %30 {strides = array<i32>} : memref<8x512xf32, #tpu.memory_space<vmem>>, vector<8x512xf32>,
    return
  }
  func.func @transform_0(%arg0: i32) -> (i32, i32, i32) {
    %c0_i32 = arith.constant 0 : i32
    %c0_i32_0 = arith.constant 0 : i32
    %c0_i32_1 = arith.constant 0 : i32
    return %arg0, %c0_i32, %c0_i32_0 : i32, i32, i32
  }
  func.func @transform_1(%arg0: i32) -> (i32, i32) {
    %c0_i32 = arith.constant 0 : i32
    %c0_i32_0 = arith.constant 0 : i32
    %c0_i32_1 = arith.constant 0 : i32
    return %c0_i32, %c0_i32_0 : i32, i32
  }
  func.func @transform_2(%arg0: i32) -> (i32, i32) {
    %c0_i32 = arith.constant 0 : i32
    %c0_i32_0 = arith.constant 0 : i32
    %c0_i32_1 = arith.constant 0 : i32
    return %c0_i32, %c0_i32_0 : i32, i32
  }
  func.func @transform_3(%arg0: i32) -> (i32, i32) {
    %c0_i32 = arith.constant 0 : i32
    %c0_i32_0 = arith.constant 0 : i32
    %c0_i32_1 = arith.constant 0 : i32
    return %c0_i32, %c0_i32_0 : i32, i32
  }
  func.func @transform_4(%arg0: i32) -> (i32, i32) {
    %c0_i32 = arith.constant 0 : i32
    %c0_i32_0 = arith.constant 0 : i32
    return %c0_i32, %arg0 : i32, i32
  }
}

module attributes {stable_mosaic.version = 11 : i64} {
  func.func @_conv_mm_kernel(%arg0: i32, %arg1: memref<1x8x278xf32, #tpu.memory_space<vmem>>, %arg2: memref<8x72xf32, #tpu.memory_space<vmem>>, %arg3: memref<8x1xf32, #tpu.memory_space<vmem>>, %arg4: memref<8x1xf32, #tpu.memory_space<vmem>>, %arg5: memref<8x256xf32, #tpu.memory_space<vmem>>, %arg6: memref<72x256xf32, #tpu.memory_space<vmem>>) attributes {dimension_semantics = [#tpu.dimension_semantics<parallel>], iteration_bounds = array<i64: 1>, scalar_prefetch = 0 : i64, scratch_operands = 1 : i64, tpu.core_type = #tpu.core_type<tc>, window_params = [{transform_indices = @transform_0, window_bounds = array<i64: 1, 8, 278>}, {pipeline_mode = #tpu.pipeline_mode<synchronous>, transform_indices = @transform_1, window_bounds = array<i64: 8, 72>}, {pipeline_mode = #tpu.pipeline_mode<synchronous>, transform_indices = @transform_2, window_bounds = array<i64: 8, 1>}, {pipeline_mode = #tpu.pipeline_mode<synchronous>, transform_indices = @transform_3, window_bounds = array<i64: 8, 1>}, {transform_indices = @transform_4, window_bounds = array<i64: 8, 256>}]} {
    %c0 = arith.constant 0 : index
    %c0_0 = arith.constant 0 : index
    %c0_1 = arith.constant 0 : index
    %0 = vector.load %arg1[%c0, %c0_0, %c0_1] : memref<1x8x278xf32, #tpu.memory_space<vmem>>, vector<1x8x278xf32>
    %1 = vector.shape_cast %0 : vector<1x8x278xf32> to vector<8x278xf32>
    %2 = vector.extract_strided_slice %1 {offsets = [0, 0], sizes = [8, 256], strides = [1, 1]} : vector<8x278xf32> to vector<8x256xf32>
    %c0_2 = arith.constant 0 : index
    %c0_3 = arith.constant 0 : index
    %3 = vector.load %arg6[%c0_2, %c0_3] : memref<72x256xf32, #tpu.memory_space<vmem>>, vector<8x256xf32>
    tpu.vector_store %arg6[%c0_2, %c0_3], %2 {strides = array<i32>} : memref<72x256xf32, #tpu.memory_space<vmem>>, vector<8x256xf32>,
    %4 = vector.extract_strided_slice %1 {offsets = [0, 1], sizes = [8, 256], strides = [1, 1]} : vector<8x278xf32> to vector<8x256xf32>
    %c8 = arith.constant 8 : index
    %c0_4 = arith.constant 0 : index
    %5 = vector.load %arg6[%c8, %c0_4] : memref<72x256xf32, #tpu.memory_space<vmem>>, vector<8x256xf32>
    tpu.vector_store %arg6[%c8, %c0_4], %4 {strides = array<i32>} : memref<72x256xf32, #tpu.memory_space<vmem>>, vector<8x256xf32>,
    %6 = vector.extract_strided_slice %1 {offsets = [0, 2], sizes = [8, 256], strides = [1, 1]} : vector<8x278xf32> to vector<8x256xf32>
    %c16 = arith.constant 16 : index
    %c0_5 = arith.constant 0 : index
    %7 = vector.load %arg6[%c16, %c0_5] : memref<72x256xf32, #tpu.memory_space<vmem>>, vector<8x256xf32>
    tpu.vector_store %arg6[%c16, %c0_5], %6 {strides = array<i32>} : memref<72x256xf32, #tpu.memory_space<vmem>>, vector<8x256xf32>,
    %8 = vector.extract_strided_slice %1 {offsets = [0, 10], sizes = [8, 256], strides = [1, 1]} : vector<8x278xf32> to vector<8x256xf32>
    %c24 = arith.constant 24 : index
    %c0_6 = arith.constant 0 : index
    %9 = vector.load %arg6[%c24, %c0_6] : memref<72x256xf32, #tpu.memory_space<vmem>>, vector<8x256xf32>
    tpu.vector_store %arg6[%c24, %c0_6], %8 {strides = array<i32>} : memref<72x256xf32, #tpu.memory_space<vmem>>, vector<8x256xf32>,
    %10 = vector.extract_strided_slice %1 {offsets = [0, 11], sizes = [8, 256], strides = [1, 1]} : vector<8x278xf32> to vector<8x256xf32>
    %c32 = arith.constant 32 : index
    %c0_7 = arith.constant 0 : index
    %11 = vector.load %arg6[%c32, %c0_7] : memref<72x256xf32, #tpu.memory_space<vmem>>, vector<8x256xf32>
    tpu.vector_store %arg6[%c32, %c0_7], %10 {strides = array<i32>} : memref<72x256xf32, #tpu.memory_space<vmem>>, vector<8x256xf32>,
    %12 = vector.extract_strided_slice %1 {offsets = [0, 12], sizes = [8, 256], strides = [1, 1]} : vector<8x278xf32> to vector<8x256xf32>
    %c40 = arith.constant 40 : index
    %c0_8 = arith.constant 0 : index
    %13 = vector.load %arg6[%c40, %c0_8] : memref<72x256xf32, #tpu.memory_space<vmem>>, vector<8x256xf32>
    tpu.vector_store %arg6[%c40, %c0_8], %12 {strides = array<i32>} : memref<72x256xf32, #tpu.memory_space<vmem>>, vector<8x256xf32>,
    %14 = vector.extract_strided_slice %1 {offsets = [0, 20], sizes = [8, 256], strides = [1, 1]} : vector<8x278xf32> to vector<8x256xf32>
    %c48 = arith.constant 48 : index
    %c0_9 = arith.constant 0 : index
    %15 = vector.load %arg6[%c48, %c0_9] : memref<72x256xf32, #tpu.memory_space<vmem>>, vector<8x256xf32>
    tpu.vector_store %arg6[%c48, %c0_9], %14 {strides = array<i32>} : memref<72x256xf32, #tpu.memory_space<vmem>>, vector<8x256xf32>,
    %16 = vector.extract_strided_slice %1 {offsets = [0, 21], sizes = [8, 256], strides = [1, 1]} : vector<8x278xf32> to vector<8x256xf32>
    %c56 = arith.constant 56 : index
    %c0_10 = arith.constant 0 : index
    %17 = vector.load %arg6[%c56, %c0_10] : memref<72x256xf32, #tpu.memory_space<vmem>>, vector<8x256xf32>
    tpu.vector_store %arg6[%c56, %c0_10], %16 {strides = array<i32>} : memref<72x256xf32, #tpu.memory_space<vmem>>, vector<8x256xf32>,
    %18 = vector.extract_strided_slice %1 {offsets = [0, 22], sizes = [8, 256], strides = [1, 1]} : vector<8x278xf32> to vector<8x256xf32>
    %c64 = arith.constant 64 : index
    %c0_11 = arith.constant 0 : index
    %19 = vector.load %arg6[%c64, %c0_11] : memref<72x256xf32, #tpu.memory_space<vmem>>, vector<8x256xf32>
    tpu.vector_store %arg6[%c64, %c0_11], %18 {strides = array<i32>} : memref<72x256xf32, #tpu.memory_space<vmem>>, vector<8x256xf32>,
    %c0_12 = arith.constant 0 : index
    %c0_13 = arith.constant 0 : index
    %20 = vector.load %arg2[%c0_12, %c0_13] : memref<8x72xf32, #tpu.memory_space<vmem>>, vector<8x72xf32>
    %c0_14 = arith.constant 0 : index
    %c0_15 = arith.constant 0 : index
    %21 = vector.load %arg6[%c0_14, %c0_15] : memref<72x256xf32, #tpu.memory_space<vmem>>, vector<72x256xf32>
    %cst = arith.constant dense<0.000000e+00> : vector<8x256xf32>
    %22 = tpu.matmul %20, %21, %cst {dimension_numbers = #tpu.dot_dimension_numbers<[1], [0], [0], [1], [0, 0, 1, 1], [], []>} : vector<8x72xf32>, vector<72x256xf32>, vector<8x256xf32> -> vector<8x256xf32>
    %c0_16 = arith.constant 0 : index
    %c0_17 = arith.constant 0 : index
    %23 = vector.load %arg3[%c0_16, %c0_17] : memref<8x1xf32, #tpu.memory_space<vmem>>, vector<8x1xf32>
    %24 = vector.broadcast %23 : vector<8x1xf32> to vector<8x256xf32>
    %25 = arith.mulf %22, %24 : vector<8x256xf32>
    %c0_18 = arith.constant 0 : index
    %c0_19 = arith.constant 0 : index
    %26 = vector.load %arg4[%c0_18, %c0_19] : memref<8x1xf32, #tpu.memory_space<vmem>>, vector<8x1xf32>
    %27 = vector.broadcast %26 : vector<8x1xf32> to vector<8x256xf32>
    %28 = arith.addf %25, %27 : vector<8x256xf32>
    %cst_20 = arith.constant 0.000000e+00 : f32
    %29 = vector.broadcast %cst_20 : f32 to vector<8x256xf32>
    %30 = arith.maximumf %28, %29 : vector<8x256xf32>
    %c0_21 = arith.constant 0 : index
    %c0_22 = arith.constant 0 : index
    %31 = vector.load %arg5[%c0_21, %c0_22] : memref<8x256xf32, #tpu.memory_space<vmem>>, vector<8x256xf32>
    tpu.vector_store %arg5[%c0_21, %c0_22], %30 {strides = array<i32>} : memref<8x256xf32, #tpu.memory_space<vmem>>, vector<8x256xf32>,
    return
  }
  func.func @transform_0(%arg0: i32) -> (i32, i32, i32) {
    %c0_i32 = arith.constant 0 : i32
    %c0_i32_0 = arith.constant 0 : i32
    %c0_i32_1 = arith.constant 0 : i32
    return %arg0, %c0_i32, %c0_i32_0 : i32, i32, i32
  }
  func.func @transform_1(%arg0: i32) -> (i32, i32) {
    %c0_i32 = arith.constant 0 : i32
    %c0_i32_0 = arith.constant 0 : i32
    %c0_i32_1 = arith.constant 0 : i32
    return %c0_i32, %c0_i32_0 : i32, i32
  }
  func.func @transform_2(%arg0: i32) -> (i32, i32) {
    %c0_i32 = arith.constant 0 : i32
    %c0_i32_0 = arith.constant 0 : i32
    %c0_i32_1 = arith.constant 0 : i32
    return %c0_i32, %c0_i32_0 : i32, i32
  }
  func.func @transform_3(%arg0: i32) -> (i32, i32) {
    %c0_i32 = arith.constant 0 : i32
    %c0_i32_0 = arith.constant 0 : i32
    %c0_i32_1 = arith.constant 0 : i32
    return %c0_i32, %c0_i32_0 : i32, i32
  }
  func.func @transform_4(%arg0: i32) -> (i32, i32) {
    %c0_i32 = arith.constant 0 : i32
    %c0_i32_0 = arith.constant 0 : i32
    return %c0_i32, %arg0 : i32, i32
  }
}

module attributes {stable_mosaic.version = 11 : i64} {
  func.func @_fuse_kernel(%arg0: i32, %arg1: memref<8x512xf32, #tpu.memory_space<vmem>>, %arg2: memref<3x8xf32, #tpu.memory_space<vmem>>, %arg3: memref<3x1xf32, #tpu.memory_space<vmem>>, %arg4: memref<8x512xf32, #tpu.memory_space<vmem>>, %arg5: memref<8x512xf32, #tpu.memory_space<vmem>>, %arg6: memref<8x512xf32, #tpu.memory_space<vmem>>, %arg7: memref<8x512xf32, #tpu.memory_space<vmem>>) attributes {dimension_semantics = [#tpu.dimension_semantics<parallel>], iteration_bounds = array<i64: 1>, scalar_prefetch = 0 : i64, scratch_operands = 0 : i64, tpu.core_type = #tpu.core_type<tc>, window_params = [{transform_indices = @transform_0, window_bounds = array<i64: 8, 512>}, {pipeline_mode = #tpu.pipeline_mode<synchronous>, transform_indices = @transform_1, window_bounds = array<i64: 3, 8>}, {pipeline_mode = #tpu.pipeline_mode<synchronous>, transform_indices = @transform_2, window_bounds = array<i64: 3, 1>}, {transform_indices = @transform_3, window_bounds = array<i64: 8, 512>}, {transform_indices = @transform_4, window_bounds = array<i64: 8, 512>}, {transform_indices = @transform_5, window_bounds = array<i64: 8, 512>}, {transform_indices = @transform_6, window_bounds = array<i64: 8, 512>}]} {
    %c0 = arith.constant 0 : index
    %c0_0 = arith.constant 0 : index
    %0 = vector.load %arg2[%c0, %c0_0] : memref<3x8xf32, #tpu.memory_space<vmem>>, vector<3x8xf32>
    %c0_1 = arith.constant 0 : index
    %c0_2 = arith.constant 0 : index
    %1 = vector.load %arg1[%c0_1, %c0_2] : memref<8x512xf32, #tpu.memory_space<vmem>>, vector<8x512xf32>
    %cst = arith.constant dense<0.000000e+00> : vector<3x512xf32>
    %2 = tpu.matmul %0, %1, %cst {dimension_numbers = #tpu.dot_dimension_numbers<[1], [0], [0], [1], [0, 0, 1, 1], [], []>} : vector<3x8xf32>, vector<8x512xf32>, vector<3x512xf32> -> vector<3x512xf32>
    %c0_3 = arith.constant 0 : index
    %c0_4 = arith.constant 0 : index
    %3 = vector.load %arg3[%c0_3, %c0_4] : memref<3x1xf32, #tpu.memory_space<vmem>>, vector<3x1xf32>
    %4 = vector.broadcast %3 : vector<3x1xf32> to vector<3x512xf32>
    %5 = arith.addf %2, %4 : vector<3x512xf32>
    %cst_5 = arith.constant dense<0xFF800000> : vector<512xf32>
    %6 = vector.multi_reduction <maximumf>, %5, %cst_5 [0] : vector<3x512xf32> to vector<512xf32>
    %7 = vector.shape_cast %6 : vector<512xf32> to vector<1x512xf32>
    %8 = vector.broadcast %7 : vector<1x512xf32> to vector<3x512xf32>
    %9 = arith.subf %5, %8 : vector<3x512xf32>
    %10 = math.exp %9 : vector<3x512xf32>
    %cst_6 = arith.constant dense<0.000000e+00> : vector<512xf32>
    %11 = vector.multi_reduction <add>, %10, %cst_6 [0] : vector<3x512xf32> to vector<512xf32>
    %12 = vector.shape_cast %11 : vector<512xf32> to vector<1x512xf32>
    %13 = tpu.reciprocal %12 {approx = true} : vector<1x512xf32> -> vector<1x512xf32>
    %14 = vector.broadcast %13 : vector<1x512xf32> to vector<3x512xf32>
    %15 = arith.mulf %10, %14 : vector<3x512xf32>
    %16 = vector.extract_strided_slice %15 {offsets = [0, 0], sizes = [1, 512], strides = [1, 1]} : vector<3x512xf32> to vector<1x512xf32>
    %c0_7 = arith.constant 0 : index
    %c0_8 = arith.constant 0 : index
    %17 = vector.load %arg4[%c0_7, %c0_8] : memref<8x512xf32, #tpu.memory_space<vmem>>, vector<8x512xf32>
    %18 = vector.broadcast %16 : vector<1x512xf32> to vector<8x512xf32>
    %19 = arith.mulf %18, %17 : vector<8x512xf32>
    %20 = vector.extract_strided_slice %15 {offsets = [1, 0], sizes = [1, 512], strides = [1, 1]} : vector<3x512xf32> to vector<1x512xf32>
    %c0_9 = arith.constant 0 : index
    %c0_10 = arith.constant 0 : index
    %21 = vector.load %arg5[%c0_9, %c0_10] : memref<8x512xf32, #tpu.memory_space<vmem>>, vector<8x512xf32>
    %22 = vector.broadcast %20 : vector<1x512xf32> to vector<8x512xf32>
    %23 = arith.mulf %22, %21 : vector<8x512xf32>
    %24 = arith.addf %19, %23 : vector<8x512xf32>
    %25 = vector.extract_strided_slice %15 {offsets = [2, 0], sizes = [1, 512], strides = [1, 1]} : vector<3x512xf32> to vector<1x512xf32>
    %c0_11 = arith.constant 0 : index
    %c0_12 = arith.constant 0 : index
    %26 = vector.load %arg6[%c0_11, %c0_12] : memref<8x512xf32, #tpu.memory_space<vmem>>, vector<8x512xf32>
    %27 = vector.broadcast %25 : vector<1x512xf32> to vector<8x512xf32>
    %28 = arith.mulf %27, %26 : vector<8x512xf32>
    %29 = arith.addf %24, %28 : vector<8x512xf32>
    %c0_13 = arith.constant 0 : index
    %c0_14 = arith.constant 0 : index
    %30 = vector.load %arg7[%c0_13, %c0_14] : memref<8x512xf32, #tpu.memory_space<vmem>>, vector<8x512xf32>
    tpu.vector_store %arg7[%c0_13, %c0_14], %29 {strides = array<i32>} : memref<8x512xf32, #tpu.memory_space<vmem>>, vector<8x512xf32>,
    return
  }
  func.func @transform_0(%arg0: i32) -> (i32, i32) {
    %c0_i32 = arith.constant 0 : i32
    %c0_i32_0 = arith.constant 0 : i32
    return %c0_i32, %arg0 : i32, i32
  }
  func.func @transform_1(%arg0: i32) -> (i32, i32) {
    %c0_i32 = arith.constant 0 : i32
    %c0_i32_0 = arith.constant 0 : i32
    %c0_i32_1 = arith.constant 0 : i32
    return %c0_i32, %c0_i32_0 : i32, i32
  }
  func.func @transform_2(%arg0: i32) -> (i32, i32) {
    %c0_i32 = arith.constant 0 : i32
    %c0_i32_0 = arith.constant 0 : i32
    %c0_i32_1 = arith.constant 0 : i32
    return %c0_i32, %c0_i32_0 : i32, i32
  }
  func.func @transform_3(%arg0: i32) -> (i32, i32) {
    %c0_i32 = arith.constant 0 : i32
    %c0_i32_0 = arith.constant 0 : i32
    return %c0_i32, %arg0 : i32, i32
  }
  func.func @transform_4(%arg0: i32) -> (i32, i32) {
    %c0_i32 = arith.constant 0 : i32
    %c0_i32_0 = arith.constant 0 : i32
    return %c0_i32, %arg0 : i32, i32
  }
  func.func @transform_5(%arg0: i32) -> (i32, i32) {
    %c0_i32 = arith.constant 0 : i32
    %c0_i32_0 = arith.constant 0 : i32
    return %c0_i32, %arg0 : i32, i32
  }
  func.func @transform_6(%arg0: i32) -> (i32, i32) {
    %c0_i32 = arith.constant 0 : i32
    %c0_i32_0 = arith.constant 0 : i32
    return %c0_i32, %arg0 : i32, i32
  }
}

module attributes {stable_mosaic.version = 11 : i64} {
  func.func @_trans0_kernel(%arg0: i32, %arg1: memref<8x512xf32, #tpu.memory_space<vmem>>, %arg2: memref<8x512xf32, #tpu.memory_space<vmem>>, %arg3: memref<8x512xf32, #tpu.memory_space<vmem>>, %arg4: memref<8x24xf32, #tpu.memory_space<vmem>>, %arg5: memref<8x1xf32, #tpu.memory_space<vmem>>, %arg6: memref<8x1xf32, #tpu.memory_space<vmem>>, %arg7: memref<8x512xf32, #tpu.memory_space<vmem>>) attributes {dimension_semantics = [#tpu.dimension_semantics<parallel>], iteration_bounds = array<i64: 1>, scalar_prefetch = 0 : i64, scratch_operands = 0 : i64, tpu.core_type = #tpu.core_type<tc>, window_params = [{transform_indices = @transform_0, window_bounds = array<i64: 8, 512>}, {transform_indices = @transform_1, window_bounds = array<i64: 8, 512>}, {transform_indices = @transform_2, window_bounds = array<i64: 8, 512>}, {pipeline_mode = #tpu.pipeline_mode<synchronous>, transform_indices = @transform_3, window_bounds = array<i64: 8, 24>}, {pipeline_mode = #tpu.pipeline_mode<synchronous>, transform_indices = @transform_4, window_bounds = array<i64: 8, 1>}, {pipeline_mode = #tpu.pipeline_mode<synchronous>, transform_indices = @transform_5, window_bounds = array<i64: 8, 1>}, {transform_indices = @transform_6, window_bounds = array<i64: 8, 512>}]} {
    %c0 = arith.constant 0 : index
    %c0_0 = arith.constant 0 : index
    %0 = vector.load %arg1[%c0, %c0_0] : memref<8x512xf32, #tpu.memory_space<vmem>>, vector<8x512xf32>
    %c0_1 = arith.constant 0 : index
    %c0_2 = arith.constant 0 : index
    %1 = vector.load %arg2[%c0_1, %c0_2] : memref<8x512xf32, #tpu.memory_space<vmem>>, vector<8x512xf32>
    %c0_3 = arith.constant 0 : index
    %c0_4 = arith.constant 0 : index
    %2 = vector.load %arg3[%c0_3, %c0_4] : memref<8x512xf32, #tpu.memory_space<vmem>>, vector<8x512xf32>
    %3 = tpu.concatenate %0, %1, %2 in 0 : vector<8x512xf32>, vector<8x512xf32>, vector<8x512xf32> -> vector<24x512xf32>
    %c0_5 = arith.constant 0 : index
    %c0_6 = arith.constant 0 : index
    %4 = vector.load %arg4[%c0_5, %c0_6] : memref<8x24xf32, #tpu.memory_space<vmem>>, vector<8x24xf32>
    %cst = arith.constant dense<0.000000e+00> : vector<8x512xf32>
    %5 = tpu.matmul %4, %3, %cst {dimension_numbers = #tpu.dot_dimension_numbers<[1], [0], [0], [1], [0, 0, 1, 1], [], []>} : vector<8x24xf32>, vector<24x512xf32>, vector<8x512xf32> -> vector<8x512xf32>
    %c0_7 = arith.constant 0 : index
    %c0_8 = arith.constant 0 : index
    %6 = vector.load %arg5[%c0_7, %c0_8] : memref<8x1xf32, #tpu.memory_space<vmem>>, vector<8x1xf32>
    %7 = vector.broadcast %6 : vector<8x1xf32> to vector<8x512xf32>
    %8 = arith.mulf %5, %7 : vector<8x512xf32>
    %c0_9 = arith.constant 0 : index
    %c0_10 = arith.constant 0 : index
    %9 = vector.load %arg6[%c0_9, %c0_10] : memref<8x1xf32, #tpu.memory_space<vmem>>, vector<8x1xf32>
    %10 = vector.broadcast %9 : vector<8x1xf32> to vector<8x512xf32>
    %11 = arith.addf %8, %10 : vector<8x512xf32>
    %cst_11 = arith.constant 0.000000e+00 : f32
    %12 = vector.broadcast %cst_11 : f32 to vector<8x512xf32>
    %13 = arith.maximumf %11, %12 : vector<8x512xf32>
    %c0_12 = arith.constant 0 : index
    %c0_13 = arith.constant 0 : index
    %14 = vector.load %arg7[%c0_12, %c0_13] : memref<8x512xf32, #tpu.memory_space<vmem>>, vector<8x512xf32>
    tpu.vector_store %arg7[%c0_12, %c0_13], %13 {strides = array<i32>} : memref<8x512xf32, #tpu.memory_space<vmem>>, vector<8x512xf32>,
    return
  }
  func.func @transform_0(%arg0: i32) -> (i32, i32) {
    %c0_i32 = arith.constant 0 : i32
    %c0_i32_0 = arith.constant 0 : i32
    return %c0_i32, %arg0 : i32, i32
  }
  func.func @transform_1(%arg0: i32) -> (i32, i32) {
    %c0_i32 = arith.constant 0 : i32
    %c0_i32_0 = arith.constant 0 : i32
    return %c0_i32, %arg0 : i32, i32
  }
  func.func @transform_2(%arg0: i32) -> (i32, i32) {
    %c0_i32 = arith.constant 0 : i32
    %c0_i32_0 = arith.constant 0 : i32
    return %c0_i32, %arg0 : i32, i32
  }
  func.func @transform_3(%arg0: i32) -> (i32, i32) {
    %c0_i32 = arith.constant 0 : i32
    %c0_i32_0 = arith.constant 0 : i32
    %c0_i32_1 = arith.constant 0 : i32
    return %c0_i32, %c0_i32_0 : i32, i32
  }
  func.func @transform_4(%arg0: i32) -> (i32, i32) {
    %c0_i32 = arith.constant 0 : i32
    %c0_i32_0 = arith.constant 0 : i32
    %c0_i32_1 = arith.constant 0 : i32
    return %c0_i32, %c0_i32_0 : i32, i32
  }
  func.func @transform_5(%arg0: i32) -> (i32, i32) {
    %c0_i32 = arith.constant 0 : i32
    %c0_i32_0 = arith.constant 0 : i32
    %c0_i32_1 = arith.constant 0 : i32
    return %c0_i32, %c0_i32_0 : i32, i32
  }
  func.func @transform_6(%arg0: i32) -> (i32, i32) {
    %c0_i32 = arith.constant 0 : i32
    %c0_i32_0 = arith.constant 0 : i32
    return %c0_i32, %arg0 : i32, i32
  }
}

</mosaic_0001>

<bundles_post_ra>
// kernel: siu_forward.10
= control target key start
LH: loop header
LB: loop body
LE: loop exit
PB: predicated region body
PF: predicated region fallthrough
CT: control target
= control target key end

     0   :  { %s1466_s15 = smov 0   ;;  %s2079_s0 = inlined_call_operand.vmem [shape: f32[6,8,660], index: 0, kind: input, shape index: {}]   ;;  %s2080_s1 = inlined_call_operand.vmem [shape: f32[8,200], index: 1, kind: input, shape index: {}]   ;;  %s2081_s2 = inlined_call_operand.vmem [shape: f32[8,1], index: 2, kind: input, shape index: {}]   ;;  %s2082_s3 = inlined_call_operand.vmem [shape: f32[8,1], index: 3, kind: input, shape index: {}]   ;;  %s2083_s4 = inlined_call_operand.vmem [shape: f32[8,3072], index: 4, kind: output, shape index: {}]  }
   0x1 LB: > { %s1472_s16 = sadd.s32 4294967295, %s1414_s15   ;;  %p1121_p0 = scmp.ge.s32.totalorder %s1414_s15, 1  ;;  %s1414_s15 = sphi %s1466_s15, %s14_s15  }
   0x2   : > { %p162_p1 = scmp.lt.s32.totalorder %s1414_s15, 7 }
   0x4   : > { %p163_p2 = pnand %p1121_p0, %p162_p1 }
   0x6   : > { %166 = sbr.rel (%p163_p2) target bundleno = 492 (0x1ec), region = 36 }
   0xb   : > { %p188_p3 = scmp.lt.s32.totalorder %s1472_s16, 5  ;;  %s1416_s22 = smov 127   ;;  %vm247_vm0 = vcmask 1031168   ;;  %vm224_vm1 = vcmask 1039360   ;;  %vm270_vm2 = vcmask 1022976   ;;  %vm293_vm3 = vcmask 1014784  }
   0xc   : > { %s1417_s23 = smov 126   ;;  %s1418_s24 = smov 125   ;;  %vm316_vm4 = vcmask 752640   ;;  %vm339_vm5 = vcmask 744448   ;;  %vm362_vm6 = vcmask 736256   ;;  %vm385_vm7 = vcmask 728064  }
   0xd   : > { %s189_s17 = scalar_select %p188_p3, %s1472_s16, 5  ;;  %vm408_vm8 = vcmask 719872   ;;  %vm431_vm9 = vcmask 457728   ;;  %vm546_vm10 = vcmask 162816   ;;  %vm523_vm11 = vcmask 424960  }
   0xe   : > { %s1419_s25 = smov 124   ;;  %s1420_s26 = smov 92   ;;  %vm754_vm12 = vcmask 883712   ;;  %vm2100_vm13 = vcmask 433152   ;;  %vm477_vm14 = vcmask 441344   ;;  %vm454_vm15 = vcmask 449536  }
   0xf   : > { %s1131_s18 = smul.u32 48, %s189_s17  ;;  %s1421_s27 = smov 91  }
  0x10   : > { %s1422_s28 = smov 90   ;;  %s1423_s29 = smov 89  }
  0x11   : > { %s1481_s21 = scalar_lea.vmem %s2079_s0, %s1131_s18  ;;  %s1424_s30 = smov 88  }
  0x12   : > { %v1484_v0 = vld [vmem:[%s1481_s21 + $0x20] sm:$0xff]  ;;  %v201_v1 = vld [vmem:[%s1481_s21 + $0x10] sm:$0xff]  ;;  %v1488_v2 = vld [vmem:[%s1481_s21 + $0x18] sm:$0xff]  ;;  %s1425_s5 = smov 56   ;;  %s1426_s6 = smov 20  }
  0x13   : > { %222 = vrot.lane.b32.xlu1 %v1484_v0, %s1416_s22  ;;  %v1492_v3 = vpack.i.bf16 %v1488_v2, %v201_v1  ;;  %v1495_v4 = vld [vmem:[%s1481_s21] sm:$0xff]  ;;  %v1498_v5 = vld [vmem:[%s1481_s21 + $0x8] sm:$0xff]  ;;  %s1427_s7 = smov 52   ;;  %s1428_s8 = smov 55  }
  0x14   : > { %v1165_v6 = vpack.i.bf16 %v1498_v5, %v1495_v4  ;;  %v1522_v7 = vpack.i.bf16 %v201_v1, %v1498_v5  ;;  %v1529_v8 = vpack.i.bf16 %v1488_v2, %v1495_v4  ;;  %s1429_s9 = smov 54   ;;  %s1430_s10 = smov 53   ;;  %v1570_v27 = vpack.i.bf16 %v1484_v0, %v1498_v5  ;;  %v204_v36 = vld [vmem:[%s1481_s21 + $0x28] sm:$0xff] }
  0x15   : > { %1181 = vrot.lane.b32.xlu2 %v1492_v3, %s1417_s23  ;;  %s1431_s11 = smov 108   ;;  %s1432_s12 = smov 109  }
  0x16   : > { %1166 = vrot.lane.b32.xlu0 %v1165_v6, %s1416_s22  ;;  %s1433_s13 = smov 111   ;;  %s1434_s14 = smov 110  }
  0x17   : > { %s1435_s17 = smov 112   ;;  %s1436_s18 = smov 16  }
  0x18   : > { %s1437_s19 = smov 17   ;;  %s1438_s20 = smov 18  }
  0x1b   : > { %1176 = vrot.lane.b32.xlu1 %v1165_v6, %s1417_s23 }
  0x1d   : > { %245 = vrot.lane.b32.xlu2 %v1484_v0, %s1417_s23 }
  0x1e   : > { %1171 = vrot.lane.b32.xlu0 %v1492_v3, %s1416_s22  ;;  %s1439_s22 = smov 19  }
  0x23   : > { %1191 = vrot.lane.b32.xlu1 %v1492_v3, %s1418_s24 }
  0x25   : > { %268 = vrot.lane.b32.xlu2 %v1484_v0, %s1418_s24 }
  0x26   : > { %1186 = vrot.lane.b32.xlu0 %v1165_v6, %s1418_s24 }
  0x2b   : > { %1201 = vrot.lane.b32.xlu1 %v1492_v3, %s1419_s25 }
  0x2d   : > { %291 = vrot.lane.b32.xlu2 %v1484_v0, %s1419_s25 }
  0x2e   : > { %1196 = vrot.lane.b32.xlu0 %v1165_v6, %s1419_s25 }
  0x33   : > { %1211 = vrot.lane.b32.xlu1 %v1492_v3, %s1420_s26 }
  0x35   : > { %314 = vrot.lane.b32.xlu2 %v1484_v0, %s1420_s26 }
  0x36   : > { %1206 = vrot.lane.b32.xlu0 %v1165_v6, %s1420_s26 }
  0x3b   : > { %1221 = vrot.lane.b32.xlu1 %v1492_v3, %s1421_s27 }
  0x3d   : > { %337 = vrot.lane.b32.xlu2 %v1484_v0, %s1421_s27 }
  0x3e   : > { %1216 = vrot.lane.b32.xlu0 %v1165_v6, %s1421_s27 }
  0x43   : > { %1231 = vrot.lane.b32.xlu1 %v1492_v3, %s1422_s28 }
  0x45   : > { %360 = vrot.lane.b32.xlu2 %v1484_v0, %s1422_s28 }
  0x46   : > { %1226 = vrot.lane.b32.xlu0 %v1165_v6, %s1422_s28 }
  0x4b   : > { %1241 = vrot.lane.b32.xlu1 %v1492_v3, %s1423_s29 }
  0x4d   : > { %383 = vrot.lane.b32.xlu2 %v1484_v0, %s1423_s29 }
  0x4e   : > { %1236 = vrot.lane.b32.xlu0 %v1165_v6, %s1423_s29 }
  0x53   : > { %1251 = vrot.lane.b32.xlu1 %v1492_v3, %s1424_s30 }
  0x55   : > { %406 = vrot.lane.b32.xlu2 %v1484_v0, %s1424_s30 }
  0x56   : > { %1246 = vrot.lane.b32.xlu0 %v1165_v6, %s1424_s30 }
  0x5b   : > { %1261 = vrot.lane.b32.xlu1 %v1492_v3, %s1425_s5 }
  0x5d   : > { %429 = vrot.lane.b32.xlu2 %v1484_v0, %s1425_s5 }
  0x5e   : > { %1256 = vrot.lane.b32.xlu0 %v1165_v6, %s1425_s5  ;;  %s1123_s5 = sshll.u32 %s1472_s16, 2 }
  0x5f   : > { %p194_p4 = scmp.lt.s32.totalorder %s1123_s5, 23 }
  0x61   : > { %s2137_s5 = smov (!%p194_p4, %s1123_s5), 23 }
  0x63   : > { %1271 = vrot.lane.b32.xlu1 %v1522_v7, %s1426_s6 }
  0x65   : > { %1276 = vrot.lane.b32.xlu2 %v1522_v7, %s1427_s7 }
  0x66   : > { %1266 = vrot.lane.b32.xlu0 %v1165_v6, %s1428_s8 }
  0x6b   : > { %1286 = vrot.lane.b32.xlu1 %v1522_v7, %s1429_s9 }
  0x6d   : > { %1291 = vrot.lane.b32.xlu2 %v1529_v8, %s1426_s6 }
  0x6e   : > { %1281 = vrot.lane.b32.xlu0 %v1522_v7, %s1430_s10 }
  0x6f   : > { %v1182_v9 = vpop.permute.xlu2 %1181 }
  0x70   : > { %v1184_v10 = vunpack.i.h.bf16 %v1182_v9  ;;  %v1183_v11 = vunpack.i.l.bf16 %v1182_v9 }
  0x72   : > { %v1542_v14 = vsel %vm247_vm0, %v1183_v11, %v1184_v10 }
  0x73   : > { %1301 = vrot.lane.b32.xlu1 %v1529_v8, %s1427_s7  ;;  %2101 = vst [vmem:[#allocation3_spill] sm:$0xff] %v1542_v14 }
  0x75   : > { %1306 = vrot.lane.b32.xlu2 %v1529_v8, %s1430_s10 }
  0x76   : > { %1296 = vrot.lane.b32.xlu0 %v1492_v3, %s1428_s8 }
  0x77   : > { %v246_v12 = vpop.permute.xlu2 %245 }
  0x78   : > { %v1539_v13 = vsel %vm247_vm0, %v1184_v10, %v246_v12 }
  0x7b   : > { %544 = vrot.lane.b32.xlu1 %v1484_v0, %s1426_s6  ;;  %s1124_s6 = sshll.u32 %s2137_s5, 3 }
  0x7d   : > { %1316 = vrot.lane.b32.xlu2 %v1492_v3, %s1431_s11 }
  0x7e   : > { %1311 = vrot.lane.b32.xlu0 %v1529_v8, %s1429_s9 }
  0x7f   : > { %v269_v15 = vpop.permute.xlu2 %268 }
  0x83   : > { %1321 = vrot.lane.b32.xlu1 %v1492_v3, %s1432_s12 }
  0x85   : > { %v223_v16 = vpop.permute.xlu1 %222  ;;  %498 = vrot.lane.b32.xlu2 %v1484_v0, %s1430_s10 }
  0x86   : > { %521 = vrot.lane.b32.xlu0 %v1484_v0, %s1427_s7 }
  0x87   : > { %v292_v17 = vpop.permute.xlu2 %291 }
  0x88   : > { %v1552_v18 = vpop.permute.xlu0 %1166 }
  0x89   : > { %v2084_v24 = vunpack.i.h.bf16 %v1552_v18 }
  0x8b   : > { %475 = vrot.lane.b32.xlu1 %v1484_v0, %s1429_s9  ;;  %s197_s9 = scalar_lea.vmem %s2083_s4, %s1124_s6 }
  0x8d   : > { %1331 = vrot.lane.b32.xlu2 %v1492_v3, %s1433_s13  ;;  %v1557_v19 = vpop.permute.xlu1 %1176 }
  0x8e   : > { %v2085_v20 = vunpack.i.h.bf16 %v1557_v19  ;;  %1326 = vrot.lane.b32.xlu0 %v1492_v3, %s1434_s14 }
  0x8f   : > { %v315_v21 = vpop.permute.xlu2 %314 }
  0x90   : > { %v1172_v22 = vpop.permute.xlu0 %1171  ;;  %v1565_v23 = vsel %vm247_vm0, %v2085_v20, %v1183_v11 }
  0x91   : > { %v1174_v25 = vunpack.i.h.bf16 %v1172_v22  ;;  %v1173_v26 = vunpack.i.l.bf16 %v1172_v22 }
  0x93   : > { %452 = vrot.lane.b32.xlu1 %v1484_v0, %s1428_s8  ;;  %v1577_v28 = vsel %vm224_vm1, %v2084_v24, %v1173_v26  ;;  %v1580_v29 = vsel %vm224_vm1, %v1174_v25, %v223_v16  ;;  %v1583_v30 = vsel %vm224_vm1, %v1173_v26, %v1174_v25 }
  0x94   : > { %2102 = vst [vmem:[#allocation4_spill] sm:$0xff] %v1583_v30 }
  0x95   : > { %1341 = vrot.lane.b32.xlu2 %v1492_v3, %s1435_s17  ;;  %v1192_v31 = vpop.permute.xlu1 %1191 }
  0x96   : > { %v1194_v32 = vunpack.i.h.bf16 %v1192_v31  ;;  %v1193_v33 = vunpack.i.l.bf16 %v1192_v31  ;;  %1336 = vrot.lane.b32.xlu0 %v1570_v27, %s1431_s11 }
  0x97   : > { %v338_v34 = vpop.permute.xlu2 %337 }
  0x98   : > { %v1589_v35 = vpop.permute.xlu0 %1186  ;;  %v1593_v37 = vsel %vm270_vm2, %v1194_v32, %v269_v15  ;;  %v1596_v38 = vsel %vm270_vm2, %v1193_v33, %v1194_v32 }
  0x99   : > { %2103 = vst [vmem:[#allocation5_spill] sm:$0xff] %v1596_v38  ;;  %v2086_v39 = vunpack.i.h.bf16 %v1589_v35 }
  0x9b   : > { %752 = vrot.lane.b32.xlu1 %v204_v36, %s1431_s11  ;;  %v1603_v40 = vsel %vm270_vm2, %v2086_v39, %v1193_v33 }
  0x9d   : > { %1351 = vrot.lane.b32.xlu2 %v1522_v7, %s1436_s18  ;;  %v1202_v41 = vpop.permute.xlu1 %1201 }
  0x9e   : > { %v1204_v42 = vunpack.i.h.bf16 %v1202_v41  ;;  %v1203_v43 = vunpack.i.l.bf16 %v1202_v41  ;;  %1346 = vrot.lane.b32.xlu0 %v1570_v27, %s1432_s12 }
  0x9f   : > { %v361_v44 = vpop.permute.xlu2 %360 }
  0xa0   : > { %v1609_v45 = vpop.permute.xlu0 %1196  ;;  %v1612_v46 = vsel %vm293_vm3, %v1204_v42, %v292_v17  ;;  %v1615_v47 = vsel %vm293_vm3, %v1203_v43, %v1204_v42 }
  0xa1   : > { %2104 = vst [vmem:[#allocation6_spill] sm:$0xff] %v1615_v47  ;;  %v2087_v48 = vunpack.i.h.bf16 %v1609_v45 }
  0xa3   : > { %729 = vrot.lane.b32.xlu1 %v204_v36, %s1432_s12  ;;  %v1622_v49 = vsel %vm293_vm3, %v2087_v48, %v1203_v43 }
  0xa5   : > { %1361 = vrot.lane.b32.xlu2 %v1522_v7, %s1437_s19  ;;  %v1212_v50 = vpop.permute.xlu1 %1211 }
  0xa6   : > { %v1214_v51 = vunpack.i.h.bf16 %v1212_v50  ;;  %v1213_v52 = vunpack.i.l.bf16 %v1212_v50  ;;  %1356 = vrot.lane.b32.xlu0 %v1570_v27, %s1434_s14 }
  0xa7   : > { %v384_v53 = vpop.permute.xlu2 %383 }
  0xa8   : > { %v1628_v54 = vpop.permute.xlu0 %1206  ;;  %v1631_v55 = vsel %vm316_vm4, %v1214_v51, %v315_v21  ;;  %v1634_v56 = vsel %vm316_vm4, %v1213_v52, %v1214_v51 }
  0xa9   : > { %2105 = vst [vmem:[#allocation7_spill] sm:$0xff] %v1634_v56  ;;  %v2088_v57 = vunpack.i.h.bf16 %v1628_v54 }
  0xab   : > { %706 = vrot.lane.b32.xlu1 %v204_v36, %s1434_s14  ;;  %v1641_v58 = vsel %vm316_vm4, %v2088_v57, %v1213_v52 }
  0xad   : > { %1371 = vrot.lane.b32.xlu2 %v1522_v7, %s1438_s20  ;;  %v1222_v59 = vpop.permute.xlu1 %1221 }
  0xae   : > { %v1224_v60 = vunpack.i.h.bf16 %v1222_v59  ;;  %v1223_v61 = vunpack.i.l.bf16 %v1222_v59  ;;  %1366 = vrot.lane.b32.xlu0 %v1570_v27, %s1433_s13 }
  0xaf   : > { %v407_v62 = vpop.permute.xlu2 %406 }
  0xb0   : > { %v1647_v63 = vpop.permute.xlu0 %1216  ;;  %v1650_v1 = vsel %vm339_vm5, %v1224_v60, %v338_v34  ;;  %v1653_v3 = vsel %vm339_vm5, %v1223_v61, %v1224_v60 }
  0xb1   : > { %2106 = vst [vmem:[#allocation8_spill] sm:$0xff] %v1653_v3  ;;  %v2089_v6 = vunpack.i.h.bf16 %v1647_v63 }
  0xb3   : > { %683 = vrot.lane.b32.xlu1 %v204_v36, %s1433_s13  ;;  %v1660_v9 = vsel %vm339_vm5, %v2089_v6, %v1223_v61 }
  0xb5   : > { %1381 = vrot.lane.b32.xlu2 %v1522_v7, %s1439_s22  ;;  %v1664_v10 = vpop.permute.xlu1 %1231 }
  0xb6   : > { %v1234_v11 = vunpack.i.h.bf16 %v1664_v10  ;;  %v2090_v12 = vunpack.i.l.bf16 %v1664_v10  ;;  %1376 = vrot.lane.b32.xlu0 %v1570_v27, %s1435_s17 }
  0xb7   : > { %v430_v15 = vpop.permute.xlu2 %429 }
  0xb8   : > { %v1670_v16 = vpop.permute.xlu0 %1226  ;;  %v1673_v17 = vsel %vm362_vm6, %v1234_v11, %v361_v44  ;;  %v1678_v7 = vsel %vm362_vm6, %v2090_v12, %v1234_v11 }
  0xb9   : > { %2107 = vst [vmem:[#allocation9_spill] sm:$0xff] %v1678_v7 }
  0xbb   : > { %660 = vrot.lane.b32.xlu1 %v204_v36, %s1435_s17 }
  0xbd   : > { %v1681_v21 = vpop.permute.xlu1 %1241  ;;  %1391 = vrot.lane.b32.xlu2 %v1529_v8, %s1437_s19 }
  0xbe   : > { %v1244_v22 = vunpack.i.h.bf16 %v1681_v21  ;;  %1386 = vrot.lane.b32.xlu0 %v1529_v8, %s1436_s18  ;;  %v2091_v25 = vunpack.i.l.bf16 %v1681_v21 }
  0xbf   : > { %v1689_v26 = vpop.permute.xlu2 %1276 }
  0xc0   : > { %v1691_v27 = vpop.permute.xlu0 %1236  ;;  %v1694_v31 = vsel %vm385_vm7, %v1244_v22, %v384_v53  ;;  %v1699_v32 = vsel %vm385_vm7, %v2091_v25, %v1244_v22 }
  0xc1   : > { %2108 = vst [vmem:[#allocation10_spill] sm:$0xff] %v1699_v32 }
  0xc3   : > { %1396 = vrot.lane.b32.xlu1 %v1529_v8, %s1438_s20 }
  0xc5   : > { %v1703_v33 = vpop.permute.xlu1 %1251  ;;  %613 = vrot.lane.b32.xlu2 %v1484_v0, %s1437_s19 }
  0xc6   : > { %v1254_v34 = vunpack.i.h.bf16 %v1703_v33  ;;  %636 = vrot.lane.b32.xlu0 %v1484_v0, %s1436_s18  ;;  %v2093_v36 = vunpack.i.l.bf16 %v1703_v33 }
  0xc7   : > { %v1711_v41 = vpop.permute.xlu2 %1291 }
  0xc8   : > { %v1713_v42 = vpop.permute.xlu0 %1246  ;;  %v1716_v43 = vsel %vm408_vm8, %v1254_v34, %v407_v62  ;;  %v1721_v44 = vsel %vm408_vm8, %v2093_v36, %v1254_v34  ;;  %v1278_v62 = vunpack.i.l.bf16 %v1689_v26  ;;  %v1293_v11 = vunpack.i.l.bf16 %v1711_v41 }
  0xc9   : > { %2109 = vst [vmem:[#allocation11_spill] sm:$0xff] %v1721_v44  ;;  %v1249_v56 = vunpack.i.h.bf16 %v1713_v42 }
  0xcb   : > { %590 = vrot.lane.b32.xlu1 %v1484_v0, %s1438_s20 }
  0xcd   : > { %v1725_v50 = vpop.permute.xlu1 %1261  ;;  %567 = vrot.lane.b32.xlu2 %v1484_v0, %s1439_s22  ;;  %v1279_v0 = vunpack.i.h.bf16 %v1689_v26 }
  0xce   : > { %v1264_v51 = vunpack.i.h.bf16 %v1725_v50  ;;  %v2094_v52 = vunpack.i.l.bf16 %v1725_v50  ;;  %1401 = vrot.lane.b32.xlu0 %v1529_v8, %s1439_s22  ;;  %v2092_v8 = vunpack.i.h.bf16 %v1711_v41 }
  0xcf   : > { %v1733_v53 = vpop.permute.xlu2 %1306  ;;  %v525_v48 = vsel %vm523_vm11, %v1278_v62, %v1279_v0 }
  0xd0   : > { %v1735_v59 = vpop.permute.xlu0 %1256  ;;  %v1738_v60 = vsel %vm431_vm9, %v1264_v51, %v430_v15  ;;  %v1743_v61 = vsel %vm431_vm9, %v2094_v52, %v1264_v51  ;;  %v2097_v12 = vunpack.i.h.bf16 %v1733_v53 }
  0xd1   : > { %v1259_v30 = vunpack.i.h.bf16 %v1735_v59  ;;  %v1258_v32 = vunpack.i.l.bf16 %v1735_v59 }
  0xd5   : > { %v1272_v22 = vpop.permute.xlu1 %1271 }
  0xd6   : > { %v1274_v34 = vunpack.i.h.bf16 %v1272_v22  ;;  %v1273_v24 = vunpack.i.l.bf16 %v1272_v22 }
  0xd7   : > { %v1749_v15 = vpop.permute.xlu2 %1316 }
  0xd8   : > { %v1751_v20 = vpop.permute.xlu0 %1266  ;;  %v548_v51 = vsel %vm546_vm10, %v1273_v24, %v1274_v34  ;;  %v547_v39 = vsel %vm546_vm10, %v1293_v11, %v1273_v24  ;;  %v1759_v26 = vsel %vm546_vm10, %v1274_v34, %v2092_v8  ;;  %v2095_v57 = vunpack.i.h.bf16 %v1749_v15 }
  0xd9   : > { %913 = vmatpush.msra.mxu2 %v548_v51  ;;  %873 = vmatpush.msra.mxu0 %v547_v39  ;;  %v2096_v22 = vunpack.i.l.bf16 %v1749_v15 }
  0xdb   : > { %914 = vmatpush.msra.mxu2 %v525_v48  ;;  %v756_v39 = vsel %vm754_vm12, %v2096_v22, %v2095_v57  ;;  %v1308_v57 = vunpack.i.l.bf16 %v1733_v53 }
  0xdc   : > { %940 = vmatpush.msra.mxu3 %v756_v39 }
  0xdd   : > { %v1287_v6 = vpop.permute.xlu1 %1286 }
  0xde   : > { %v1289_v25 = vunpack.i.h.bf16 %v1287_v6  ;;  %v1288_v24 = vunpack.i.l.bf16 %v1287_v6 }
  0xdf   : > { %v1764_v11 = vpop.permute.xlu2 %498 }
  0xe0   : > { %v1282_v34 = vpop.permute.xlu0 %1281  ;;  %v479_v36 = vsel %vm477_vm14, %v1288_v24, %v1289_v25 }
  0xe1   : > { %v1284_v51 = vunpack.i.h.bf16 %v1282_v34  ;;  %v1283_v48 = vunpack.i.l.bf16 %v1282_v34 }
  0xe3   : > { %v502_v8 = vsel %vm2100_vm13, %v1283_v48, %v1284_v51  ;;  %v1776_v6 = vsel %vm2100_vm13, %v1284_v51, %v2097_v12  ;;  %v1269_v51 = vunpack.i.h.bf16 %v1751_v20 }
  0xe4   : > { %915 = vmatpush.msra.mxu2 %v502_v8 }
  0xe5   : > { %v1778_v52 = vpop.permute.xlu1 %1301 }
  0xe6   : > { %v2098_v22 = vunpack.i.h.bf16 %v1778_v52  ;;  %v1303_v39 = vunpack.i.l.bf16 %v1778_v52  ;;  %916 = vmatpush.msra.mxu2 %v479_v36  ;;  %v501_v36 = vsel %vm2100_vm13, %v1308_v57, %v1283_v48  ;;  %v1229_v48 = vunpack.i.h.bf16 %v1670_v16 }
  0xe7   : > { %v1783_v34 = vpop.permute.xlu2 %1331  ;;  %vm731_vm13 = vcmask 891904  }
  0xe8   : > { %v1786_v14 = vpop.permute.xlu0 %1296  ;;  %v524_v38 = vsel %vm523_vm11, %v1303_v39, %v1278_v62  ;;  %v1795_v47 = vsel %vm523_vm11, %v1279_v0, %v2098_v22  ;;  %v2110_v0 = vunpack.i.l.bf16 %v1725_v50  ;;  %v2111_v22 = vunpack.i.l.bf16 %v1703_v33 }
  0xe9   : > { %v2099_v8 = vunpack.i.h.bf16 %v1786_v14  ;;  %v1298_v12 = vunpack.i.l.bf16 %v1786_v14  ;;  %874 = vmatpush.msra.mxu0 %v524_v38  ;;  %v1239_v38 = vunpack.i.h.bf16 %v1691_v27 }
  0xea   : > { %v433_v57 = vsel %vm431_vm9, %v1259_v30, %v2110_v0  ;;  %v410_v7 = vsel %vm408_vm8, %v1249_v56, %v2111_v22  ;;  %v2112_v0 = vunpack.i.l.bf16 %v1681_v21  ;;  %v2113_v22 = vunpack.i.l.bf16 %v1664_v10 }
  0xeb   : > { %875 = vmatpush.msra.mxu0 %v501_v36  ;;  %v456_v62 = vsel %vm454_vm15, %v1269_v51, %v1298_v12  ;;  %v1803_v39 = vsel %vm454_vm15, %v1298_v12, %v2099_v8 }
  0xec   : > { %917 = vmatpush.msra.mxu2 %v456_v62  ;;  %v1268_v62 = vunpack.i.l.bf16 %v1751_v20  ;;  %v364_v44 = vsel %vm362_vm6, %v1229_v48, %v2113_v22 }
  0xed   : > { %v1806_v3 = vpop.permute.xlu1 %544 }
  0xee   : > { %918 = vmatpush.msra.mxu2 %v433_v57  ;;  %v387_v57 = vsel %vm385_vm7, %v1239_v38, %v2112_v0  ;;  %v455_v0 = vsel %vm454_vm15, %v1268_v62, %v1269_v51  ;;  %v1228_v51 = vunpack.i.l.bf16 %v1670_v16  ;;  %v1198_v16 = vunpack.i.l.bf16 %v1609_v45 }
  0xef   : > { %v1812_v36 = vpop.permute.xlu2 %1341 }
  0xf0   : > { %v1817_v12 = vpop.permute.xlu0 %1311  ;;  %919 = vmatpush.msra.mxu2 %v410_v7  ;;  %v1248_v7 = vunpack.i.l.bf16 %v1713_v42  ;;  %v363_v62 = vsel %vm362_vm6, %v1228_v51, %v1229_v48  ;;  %v2115_v48 = vunpack.i.h.bf16 %v1628_v54  ;;  %vm708_vm6 = vcmask 900096  }
  0xf1   : > { %v1314_v8 = vunpack.i.h.bf16 %v1817_v12  ;;  %v1313_v50 = vunpack.i.l.bf16 %v1817_v12 }
  0xf2   : > { %920 = vmatpush.msra.mxu2 %v387_v57 }
  0xf3   : > { %v478_v33 = vsel %vm477_vm14, %v1313_v50, %v1288_v24  ;;  %v1833_v20 = vsel %vm477_vm14, %v1289_v25, %v1314_v8  ;;  %v1238_v24 = vunpack.i.l.bf16 %v1691_v27 }
  0xf4   : > { %876 = vmatpush.msra.mxu0 %v478_v33  ;;  %921 = vmatpush.msra.mxu2 %v364_v44  ;;  %v432_v44 = vsel %vm431_vm9, %v1258_v32, %v1259_v30  ;;  %v1218_v30 = vunpack.i.l.bf16 %v1647_v63 }
  0xf5   : > { %v1836_v21 = vpop.permute.xlu1 %1321  ;;  %v386_v27 = vsel %vm385_vm7, %v1238_v24, %v1239_v38  ;;  %v2114_v38 = vunpack.i.h.bf16 %v1647_v63  ;;  %vm685_vm7 = vcmask 908288  }
  0xf6   : > { %v1324_v59 = vunpack.i.h.bf16 %v1836_v21  ;;  %v1323_v10 = vunpack.i.l.bf16 %v1836_v21  ;;  %877 = vmatpush.msra.mxu0 %v455_v0  ;;  %922 = vmatpush.msra.mxu2 %v1660_v9  ;;  %v409_v9 = vsel %vm408_vm8, %v1248_v7, %v1249_v56  ;;  %v1333_v56 = vunpack.i.l.bf16 %v1783_v34 }
  0xf7   : > { %v1843_v25 = vpop.permute.xlu2 %1351  ;;  %v340_v33 = vsel %vm339_vm5, %v1218_v30, %v2114_v38  ;;  %v1344_v7 = vunpack.i.h.bf16 %v1812_v36  ;;  %v1343_v0 = vunpack.i.l.bf16 %v1812_v36  ;;  %vm662_vm5 = vcmask 916480  }
  0xf8   : > { %v1846_v50 = vpop.permute.xlu0 %521  ;;  %878 = vmatpush.msra.mxu0 %v432_v44  ;;  %923 = vmatpush.msra.mxu2 %v1641_v58  ;;  %v733_v42 = vsel %vm731_vm13, %v1323_v10, %v1324_v59  ;;  %v1208_v58 = vunpack.i.l.bf16 %v1628_v54  ;;  %v1178_v44 = vunpack.i.l.bf16 %v1557_v19  ;;  %v1354_v54 = vunpack.i.h.bf16 %v1843_v25 }
  0xf9   : > { %941 = vmatpush.msra.mxu3 %v733_v42  ;;  %v2116_v42 = vunpack.i.h.bf16 %v1609_v45  ;;  %v1353_v51 = vunpack.i.l.bf16 %v1843_v25  ;;  %v768_v25 = vld [vmem:[%s2080_s1 + $0x8] sm:$0xff]  ;;  %vm869_vm8 = vcmask 588800  }
  0xfa   : > { %879 = vmatpush.msra.mxu0 %v409_v9  ;;  %924 = vmatpush.msra.mxu2 %v1622_v49  ;;  %v1334_v49 = vunpack.i.h.bf16 %v1783_v34 }
  0xfc   : > { %880 = vmatpush.msra.mxu0 %v386_v27  ;;  %925 = vmatpush.msra.mxu2 %v1603_v40  ;;  %v1188_v40 = vunpack.i.l.bf16 %v1589_v35  ;;  %v687_v45 = vsel %vm685_vm7, %v1333_v56, %v1334_v49  ;;  %v2117_v27 = vunpack.i.h.bf16 %v1589_v35 }
  0xfd   : > { %v1861_v32 = vpop.permute.xlu1 %475 }
  0xfe   : > { %881 = vmatpush.msra.mxu0 %v363_v62  ;;  %926 = vmatpush.msra.mxu2 %v1565_v23  ;;  %v317_v23 = vsel %vm316_vm4, %v1208_v58, %v2115_v48  ;;  %v271_v58 = vsel %vm270_vm2, %v1188_v40, %v2117_v27  ;;  %v664_v62 = vsel %vm662_vm5, %v1343_v0, %v1344_v7  ;;  %v2118_v48 = vunpack.i.h.bf16 %v1557_v19 }
  0xff   : > { %v1868_v57 = vpop.permute.xlu2 %1361  ;;  %vm615_vm2 = vcmask 138240   ;;  %v2120_v27 = vunpack.i.l.bf16 %v1749_v15  ;;  %vm2124_vm4 = vcmask 433152  }
 0x100   : > { %v1874_v22 = vpop.permute.xlu0 %1326  ;;  %882 = vmatpush.msra.mxu0 %v340_v33  ;;  %927 = vmatpush.msra.mxu2 %v1577_v28  ;;  %v294_v28 = vsel %vm293_vm3, %v1198_v16, %v2116_v42  ;;  %vm638_vm3 = vcmask 130048   ;;  %v1364_v16 = vunpack.i.h.bf16 %v1868_v57  ;;  %v1363_v38 = vunpack.i.l.bf16 %v1868_v57 }
 0x101   : > { %v1329_v63 = vunpack.i.h.bf16 %v1874_v22  ;;  %v1328_v24 = vunpack.i.l.bf16 %v1874_v22  ;;  %v248_v35 = vsel %vm247_vm0, %v1178_v44, %v2118_v48  ;;  %v640_v40 = vsel %vm638_vm3, %v1353_v51, %v1354_v54 }
 0x102   : > { %883 = vmatpush.msra.mxu0 %v317_v23  ;;  %928 = vmatpush.msra.mxu2 %v1498_v5  ;;  %v1168_v5 = vunpack.i.l.bf16 %v1552_v18  ;;  %v617_v44 = vsel %vm615_vm2, %v1363_v38, %v1364_v16  ;;  %vm592_vm0 = vcmask 146432  }
 0x103   : > { %v710_v9 = vsel %vm708_vm6, %v1328_v24, %v1329_v63 }
 0x104   : > { %884 = vmatpush.msra.mxu0 %v294_v28  ;;  %942 = vmatpush.msra.mxu3 %v710_v9 }
 0x105   : > { %v453_v30 = vpop.permute.xlu1 %452 }
 0x106   : > { %885 = vmatpush.msra.mxu0 %v271_v58  ;;  %943 = vmatpush.msra.mxu3 %v687_v45  ;;  %v2119_v45 = vunpack.i.h.bf16 %v1552_v18  ;;  %v2121_v18 = vunpack.i.h.bf16 %v1711_v41 }
 0x107   : > { %v1912_v33 = vpop.permute.xlu2 %1371 }
 0x108   : > { %v1337_v23 = vpop.permute.xlu0 %1336  ;;  %886 = vmatpush.msra.mxu0 %v248_v35  ;;  %944 = vmatpush.msra.mxu3 %v664_v62  ;;  %v1374_v42 = vunpack.i.h.bf16 %v1912_v33  ;;  %v1373_v28 = vunpack.i.l.bf16 %v1912_v33  ;;  %v225_v19 = vsel %vm224_vm1, %v1168_v5, %v2119_v45  ;;  %v550_v5 = vsel %vm546_vm10, %v2121_v18, %v1806_v3 }
 0x109   : > { %v1338_v9 = vunpack.i.l.bf16 %v1337_v23  ;;  %v1339_v62 = vunpack.i.h.bf16 %v1337_v23  ;;  %vm569_vm1 = vcmask 154624  }
 0x10a   : > { %887 = vmatpush.msra.mxu0 %v225_v19  ;;  %945 = vmatpush.msra.mxu3 %v640_v40  ;;  %v594_v35 = vsel %vm592_vm0, %v1373_v28, %v1374_v42  ;;  %v2122_v40 = vunpack.i.h.bf16 %v1778_v52  ;;  %v2123_v19 = vunpack.i.h.bf16 %v1733_v53 }
 0x10b   : > { %v755_v58 = vsel %vm754_vm12, %v1338_v9, %v2120_v27  ;;  %v481_v27 = vsel %vm477_vm14, %v1314_v8, %v1861_v32  ;;  %v2126_v8 = vunpack.i.h.bf16 %v1786_v14 }
 0x10c   : > { %888 = vmatpush.msra.mxu0 %v1495_v4  ;;  %900 = vmatpush.msra.mxu1 %v755_v58  ;;  %v527_v4 = vsel %vm523_vm11, %v2122_v40, %v1846_v50 }
 0x10d   : > { %v753_v48 = vpop.permute.xlu1 %752  ;;  %946 = vmatpush.msra.mxu3 %v617_v44  ;;  %v504_v44 = vsel %vm2124_vm4, %v2123_v19, %v1764_v11  ;;  %v2125_v11 = vunpack.i.h.bf16 %v1749_v15  ;;  %v458_v12 = vsel %vm454_vm15, %v2126_v8, %v453_v30  ;;  %v767_v19 = vld [vmem:[%s2080_s1] sm:$0xff] }
 0x10e   : > { %993 = vmatpush.msrb.mxu0 %v550_v5  ;;  %v758_v23 = vsel %vm754_vm12, %v1339_v62, %v753_v48  ;;  %929 = vmatmul.f32.vlgmr.msra.gmra.mxu2 %v767_v19 }
 0x10f   : > { %v1950_v41 = vpop.permute.xlu2 %1381  ;;  %1020 = vmatpush.msrb.mxu2 %v758_v23  ;;  %947 = vmatpush.msra.mxu3 %v594_v35  ;;  %v757_v18 = vsel %vm754_vm12, %v2125_v11, %v1339_v62 }
 0x110   : > { %994 = vmatpush.msrb.mxu0 %v527_v4  ;;  %v1384_v3 = vunpack.i.h.bf16 %v1950_v41  ;;  %v1383_v9 = vunpack.i.l.bf16 %v1950_v41  ;;  %v1347_v45 = vpop.permute.xlu0 %1346  ;;  %v1043_v41 = vld [vmem:[%s2082_s3] sm:$0xff] }
 0x111   : > { %v1349_v52 = vunpack.i.h.bf16 %v1347_v45  ;;  %v1348_v50 = vunpack.i.l.bf16 %v1347_v45  ;;  %889 = vmatmul.f32.vlgmr.msra.gmra.mxu0 %v767_v19 }
 0x112   : > { %995 = vmatpush.msrb.mxu0 %v504_v44  ;;  %v571_v58 = vsel %vm569_vm1, %v1383_v9, %v1384_v3 }
 0x113   : > { %v732_v53 = vsel %vm731_vm13, %v1348_v50, %v1323_v10  ;;  %948 = vmatpush.msra.mxu3 %v571_v58  ;;  %v734_v5 = vsel %vm731_vm13, %v1324_v59, %v1349_v52 }
 0x114   : > { %996 = vmatpush.msrb.mxu0 %v481_v27  ;;  %901 = vmatpush.msra.mxu1 %v732_v53 }
 0x115   : > { %980 = vmatpush.msrb.mxu3 %v757_v18  ;;  %v730_v32 = vpop.permute.xlu1 %729 }
 0x116   : > { %997 = vmatpush.msrb.mxu0 %v458_v12  ;;  %v735_v10 = vsel %vm731_vm13, %v1349_v52, %v730_v32  ;;  %1126 = vmatmul.msk.f32.vlgmr.msra.gmra.mxu3 %vm869_vm8, %v768_v25  ;;  %v1033_v12 = vld [vmem:[%s2081_s2] sm:$0xff]  ;;  %v2130_v32 = vld [vmem:[#allocation8_spill] sm:$0xff] }
 0x117   : > { %981 = vmatpush.msrb.mxu3 %v734_v5  ;;  %1021 = vmatpush.msrb.mxu2 %v735_v10  ;;  %v2131_v5 = vld [vmem:[#allocation7_spill] sm:$0xff]  ;;  %v2133_v10 = vld [vmem:[#allocation5_spill] sm:$0xff] }
 0x118   : > { %998 = vmatpush.msrb.mxu0 %v1738_v60  ;;  %v1357_v15 = vpop.permute.xlu0 %1356 }
 0x119   : > { %v1359_v62 = vunpack.i.h.bf16 %v1357_v15  ;;  %v1358_v48 = vunpack.i.l.bf16 %v1357_v15  ;;  %v2134_v15 = vld [vmem:[#allocation3_spill] sm:$0xff] }
 0x11a   : > { %999 = vmatpush.msrb.mxu0 %v1716_v43 }
 0x11b   : > { %v709_v14 = vsel %vm708_vm6, %v1358_v48, %v1328_v24  ;;  %v711_v21 = vsel %vm708_vm6, %v1329_v63, %v1359_v62 }
 0x11c   : > { %1000 = vmatpush.msrb.mxu0 %v1694_v31  ;;  %902 = vmatpush.msra.mxu1 %v709_v14 }
 0x11d   : > { %982 = vmatpush.msrb.mxu3 %v711_v21  ;;  %v707_v60 = vpop.permute.xlu1 %706 }
 0x11e   : > { %1001 = vmatpush.msrb.mxu0 %v1673_v17  ;;  %v712_v59 = vsel %vm708_vm6, %v1359_v62, %v707_v60 }
 0x11f   : > { %1022 = vmatpush.msrb.mxu2 %v712_v59 }
 0x120   : > { %1002 = vmatpush.msrb.mxu0 %v1650_v1  ;;  %v1367_v43 = vpop.permute.xlu0 %1366 }
 0x121   : > { %v1369_v31 = vunpack.i.h.bf16 %v1367_v43  ;;  %v1368_v30 = vunpack.i.l.bf16 %v1367_v43 }
 0x122   : > { %1003 = vmatpush.msrb.mxu0 %v1631_v55 }
 0x123   : > { %v686_v22 = vsel %vm685_vm7, %v1368_v30, %v1333_v56  ;;  %v688_v17 = vsel %vm685_vm7, %v1334_v49, %v1369_v31 }
 0x124   : > { %1004 = vmatpush.msrb.mxu0 %v1612_v46  ;;  %903 = vmatpush.msra.mxu1 %v686_v22 }
 0x125   : > { %983 = vmatpush.msrb.mxu3 %v688_v17  ;;  %v684_v1 = vpop.permute.xlu1 %683 }
 0x126   : > { %1005 = vmatpush.msrb.mxu0 %v1593_v37  ;;  %v689_v63 = vsel %vm685_vm7, %v1369_v31, %v684_v1 }
 0x127   : > { %1023 = vmatpush.msrb.mxu2 %v689_v63 }
 0x128   : > { %1006 = vmatpush.msrb.mxu0 %v1539_v13  ;;  %v1377_v55 = vpop.permute.xlu0 %1376  ;;  %v1392_v13 = vpop.permute.xlu2 %1391 }
 0x129   : > { %v1379_v46 = vunpack.i.h.bf16 %v1377_v55  ;;  %v1378_v24 = vunpack.i.l.bf16 %v1377_v55  ;;  %v1394_v40 = vunpack.i.h.bf16 %v1392_v13 }
 0x12a   : > { %1007 = vmatpush.msrb.mxu0 %v1580_v29  ;;  %v1393_v29 = vunpack.i.l.bf16 %v1392_v13 }
 0x12b   : > { %v663_v34 = vsel %vm662_vm5, %v1378_v24, %v1343_v0  ;;  %v665_v49 = vsel %vm662_vm5, %v1344_v7, %v1379_v46  ;;  %v618_v45 = vsel %vm615_vm2, %v1364_v16, %v1394_v40 }
 0x12c   : > { %1008 = vmatpush.msrb.mxu0 %v1488_v2  ;;  %904 = vmatpush.msra.mxu1 %v663_v34  ;;  %v616_v0 = vsel %vm615_vm2, %v1393_v29, %v1363_v38 }
 0x12d   : > { %984 = vmatpush.msrb.mxu3 %v665_v49  ;;  %v661_v37 = vpop.permute.xlu1 %660  ;;  %1009 = vmatmul.f32.vlgmr.msrb.gmra.mxu0 %v767_v19 }
 0x12e   : > { %v666_v56 = vsel %vm662_vm5, %v1379_v46, %v661_v37 }
 0x12f   : > { %1024 = vmatpush.msrb.mxu2 %v666_v56 }
 0x130   : > { %v1387_v35 = vpop.permute.xlu0 %1386  ;;  %v614_v44 = vpop.permute.xlu2 %613 }
 0x131   : > { %v1389_v4 = vunpack.i.h.bf16 %v1387_v35  ;;  %v1388_v23 = vunpack.i.l.bf16 %v1387_v35  ;;  %v619_v50 = vsel %vm615_vm2, %v1394_v40, %v614_v44 }
 0x133   : > { %v639_v36 = vsel %vm638_vm3, %v1388_v23, %v1353_v51  ;;  %v641_v2 = vsel %vm638_vm3, %v1354_v54, %v1389_v4 }
 0x134   : > { %905 = vmatpush.msra.mxu1 %v639_v36  ;;  %985 = vmatpush.msrb.mxu3 %v641_v2 }
 0x135   : > { %v1397_v7 = vpop.permute.xlu1 %1396 }
 0x136   : > { %v1399_v54 = vunpack.i.h.bf16 %v1397_v7  ;;  %v1398_v51 = vunpack.i.l.bf16 %v1397_v7  ;;  %906 = vmatpush.msra.mxu1 %v616_v0  ;;  %986 = vmatpush.msrb.mxu3 %v618_v45 }
 0x138   : > { %v637_v57 = vpop.permute.xlu0 %636  ;;  %v593_v16 = vsel %vm592_vm0, %v1398_v51, %v1373_v28  ;;  %v595_v38 = vsel %vm592_vm0, %v1374_v42, %v1399_v54  ;;  %v568_v11 = vpop.permute.xlu2 %567 }
 0x139   : > { %907 = vmatpush.msra.mxu1 %v593_v16  ;;  %987 = vmatpush.msrb.mxu3 %v595_v38  ;;  %v642_v52 = vsel %vm638_vm3, %v1389_v4, %v637_v57 }
 0x13a   : > { %1025 = vmatpush.msrb.mxu2 %v642_v52 }
 0x13c   : > { %1026 = vmatpush.msrb.mxu2 %v619_v50 }
 0x13d   : > { %v591_v27 = vpop.permute.xlu1 %590 }
 0x13e   : > { %v596_v58 = vsel %vm592_vm0, %v1399_v54, %v591_v27 }
 0x13f   : > { %1027 = vmatpush.msrb.mxu2 %v596_v58 }
 0x140   : > { %v1402_v53 = vpop.permute.xlu0 %1401 }
 0x141   : > { %v1404_v28 = vunpack.i.h.bf16 %v1402_v53  ;;  %v1403_v33 = vunpack.i.l.bf16 %v1402_v53 }
 0x143   : > { %v570_v42 = vsel %vm569_vm1, %v1403_v33, %v1383_v9  ;;  %v572_v18 = vsel %vm569_vm1, %v1384_v3, %v1404_v28  ;;  %v573_v8 = vsel %vm569_vm1, %v1404_v28, %v568_v11  ;;  %v1440_v3 = vmov 0   ;;  %v2129_v9 = vld [vmem:[#allocation9_spill] sm:$0xff] }
 0x144   : > { %908 = vmatpush.msra.mxu1 %v570_v42  ;;  %988 = vmatpush.msrb.mxu3 %v572_v18 }
 0x145   : > { %1028 = vmatpush.msrb.mxu2 %v573_v8  ;;  %1125 = vmatmul.msk.f32.vlgmr.msra.gmra.mxu1 %vm869_vm8, %v768_v25 }
 0x146   : > { %953 = vmatpush.msrb.mxu1 %v1759_v26  ;;  %1127 = vmatmul.msk.f32.vlgmr.msrb.gmra.mxu3 %vm869_vm8, %v768_v25  ;;  %v2128_v26 = vld [vmem:[#allocation10_spill] sm:$0xff] }
 0x147   : > { %1128 = vmatmul.msk.f32.vlgmr.msrb.gmra.mxu2 %vm869_vm8, %v768_v25  ;;  %1405 = vset.pattern.permute.xlu0 %v1440_v3 }
 0x148   : > { %954 = vmatpush.msrb.mxu1 %v1795_v47  ;;  %1406 = vset.pattern.permute.xlu1 %v1440_v3  ;;  %v2127_v47 = vld [vmem:[#allocation11_spill] sm:$0xff] }
 0x149   : > { %1036 = vperm.xlu0 %1405, %v1033_v12   ;;  %1046 = vperm.xlu1 %1406, %v1043_v41  }
 0x14a   : > { %955 = vmatpush.msrb.mxu1 %v1776_v6  ;;  %v2132_v6 = vld [vmem:[#allocation6_spill] sm:$0xff] }
 0x14c   : > { %956 = vmatpush.msrb.mxu1 %v1833_v20  ;;  %v2135_v20 = vld [vmem:[#allocation4_spill] sm:$0xff] }
 0x14e   : > { %957 = vmatpush.msrb.mxu1 %v1803_v39  ;;  %v1407_v39 = vld [vmem:[%s1481_s21 + $0x10] sm:$0xff] }
 0x150   : > { %958 = vmatpush.msrb.mxu1 %v1743_v61 }
 0x152   : > { %959 = vmatpush.msrb.mxu1 %v2127_v47 }
 0x154   : > { %960 = vmatpush.msrb.mxu1 %v2128_v26 }
 0x156   : > { %961 = vmatpush.msrb.mxu1 %v2129_v9 }
 0x158   : > { %962 = vmatpush.msrb.mxu1 %v2130_v32 }
 0x15a   : > { %963 = vmatpush.msrb.mxu1 %v2131_v5 }
 0x15c   : > { %964 = vmatpush.msrb.mxu1 %v2132_v6 }
 0x15e   : > { %965 = vmatpush.msrb.mxu1 %v2133_v10 }
 0x160   : > { %966 = vmatpush.msrb.mxu1 %v2134_v15 }
 0x162   : > { %967 = vmatpush.msrb.mxu1 %v2135_v20 }
 0x164   : > { %968 = vmatpush.msrb.mxu1 %v1407_v39 }
 0x165   : > { %969 = vmatmul.f32.vlgmr.msrb.gmra.mxu1 %v767_v19 }
 0x18e   : > { %v890_v59 = vpop.f32.mrf.mxu0 }
 0x191   : > { %v930_v61 = vpop.f32.mrf.mxu2 }
 0x199   : > { %v950_v62 = vpop.f32.mrf.mxu3 }
 0x19a   : > { %v951_v48 = vadd.f32 %v950_v62, %v930_v61 }
 0x1aa   : > { %v1010_v63 = vpop.f32.mrf.mxu0 }
 0x1bb   : > { %v1037_v14 = vpop.permute.xlu0 %1036  ;;  %v1047_v21 = vpop.permute.xlu1 %1046 }
 0x1bc   : > { %v1040_v60 = vmul.f32 %v1037_v14, %v951_v48 }
 0x1be   : > { %v1050_v43 = vadd.f32 %v1047_v21, %v1040_v60 }
 0x1c0   : > { %v1054_v31 = vmax.f32 %v1050_v43, 0.0 }
 0x1c2   : > { %v910_v30 = vpop.f32.mrf.mxu1  ;;  %1058 = vst [vmem:[%s197_s9 + $0x8] sm:$0xff] %v1054_v31 }
 0x1c3   : > { %v911_v22 = vadd.f32 %v910_v30, %v890_v59 }
 0x1c5   : > { %v1039_v17 = vmul.f32 %v1037_v14, %v911_v22 }
 0x1c7   : > { %v1049_v1 = vadd.f32 %v1047_v21, %v1039_v17 }
 0x1c9   : > { %v1053_v55 = vmax.f32 %v1049_v1, 0.0  ;;  %v990_v13 = vpop.f32.mrf.mxu3 }
 0x1ca   : > { %v1030_v46 = vpop.f32.mrf.mxu2 }
 0x1cb   : > { %v1031_v24 = vadd.f32 %v1030_v46, %v1010_v63  ;;  %1057 = vst [vmem:[%s197_s9] sm:$0xff] %v1053_v55 }
 0x1cd   : > { %v1042_v34 = vmul.f32 %v1037_v14, %v1031_v24 }
 0x1cf   : > { %v1052_v49 = vadd.f32 %v1047_v21, %v1042_v34 }
 0x1d1   : > { %v1056_v37 = vmax.f32 %v1052_v49, 0.0 }
 0x1d3   : > { %1060 = vst [vmem:[%s197_s9 + $0x18] sm:$0xff] %v1056_v37 }
 0x1e2   : > { %v970_v56 = vpop.f32.mrf.mxu1 }
 0x1e3   : > { %v991_v35 = vadd.f32 %v990_v13, %v970_v56 }
 0x1e5   : > { %v1041_v40 = vmul.f32 %v1037_v14, %v991_v35 }
 0x1e7   : > { %v1051_v29 = vadd.f32 %v1047_v21, %v1041_v40 }
 0x1e9   : > { %v1055_v4 = vmax.f32 %v1051_v29, 0.0 }
 0x1eb   : > { %1059 = vst [vmem:[%s197_s9 + $0x10] sm:$0xff] %v1055_v4 }
 0x1ec PF: > { %s14_s15 = sadd.s32 1, %s1414_s15  }
 0x1ed   : > { %p11_p5 = scmp.ge.s32.totalorder %s14_s15, 8  }
 0x1ef   :  { %13 = sbr.rel (!%p11_p5) target bundleno = 1 (0x1), region = 66 }

// kernel: siu_forward.11
= control target key start
LH: loop header
LB: loop body
LE: loop exit
PB: predicated region body
PF: predicated region fallthrough
CT: control target
= control target key end

     0   :  { %s134_s0 = inlined_call_operand.vmem [shape: f32[4,8,512], index: 0, kind: input, shape index: {}]   ;;  %s135_s1 = inlined_call_operand.vmem [shape: f32[8,512], index: 1, kind: output, shape index: {}]  }
   0x1   :  { %v8_v0 = vld [vmem:[%s134_s0] sm:$0xff]  ;;  %v9_v5 = vld [vmem:[%s134_s0 + $0x8] sm:$0xff]  ;;  %v10_v11 = vld [vmem:[%s134_s0 + $0x10] sm:$0xff] }
   0x2   :  { %v12_v1 = vld [vmem:[%s134_s0 + $0x20] sm:$0xff]  ;;  %v13_v6 = vld [vmem:[%s134_s0 + $0x28] sm:$0xff]  ;;  %v14_v15 = vld [vmem:[%s134_s0 + $0x30] sm:$0xff] }
   0x3   :  { %v16_v2 = vld [vmem:[%s134_s0 + $0x40] sm:$0xff]  ;;  %v24_v3 = vmax.f32 %v8_v0, %v12_v1  ;;  %v36_v4 = vadd.f32 %v12_v1, %v8_v0  ;;  %v17_v8 = vld [vmem:[%s134_s0 + $0x48] sm:$0xff]  ;;  %v27_v9 = vmax.f32 %v9_v5, %v13_v6  ;;  %v39_v10 = vadd.f32 %v13_v6, %v9_v5  ;;  %v18_v16 = vld [vmem:[%s134_s0 + $0x50] sm:$0xff] }
   0x4   :  { %v20_v7 = vld [vmem:[%s134_s0 + $0x60] sm:$0xff]  ;;  %v21_v14 = vld [vmem:[%s134_s0 + $0x68] sm:$0xff]  ;;  %v30_v19 = vmax.f32 %v10_v11, %v14_v15  ;;  %v42_v20 = vadd.f32 %v14_v15, %v10_v11  ;;  %v11_v21 = vld [vmem:[%s134_s0 + $0x18] sm:$0xff] }
   0x5   :  { %v25_v12 = vmax.f32 %v24_v3, %v16_v2  ;;  %v37_v13 = vadd.f32 %v36_v4, %v16_v2  ;;  %v28_v17 = vmax.f32 %v27_v9, %v17_v8  ;;  %v40_v18 = vadd.f32 %v39_v10, %v17_v8  ;;  %v15_v22 = vld [vmem:[%s134_s0 + $0x38] sm:$0xff]  ;;  %v22_v26 = vld [vmem:[%s134_s0 + $0x70] sm:$0xff] }
   0x6   :  { %v19_v23 = vld [vmem:[%s134_s0 + $0x58] sm:$0xff]  ;;  %v33_v27 = vmax.f32 %v11_v21, %v15_v22  ;;  %v45_v28 = vadd.f32 %v15_v22, %v11_v21  ;;  %v31_v31 = vmax.f32 %v30_v19, %v18_v16  ;;  %v43_v32 = vadd.f32 %v42_v20, %v18_v16 }
   0x7   :  { %v26_v24 = vmax.f32 %v25_v12, %v20_v7  ;;  %v38_v25 = vadd.f32 %v37_v13, %v20_v7  ;;  %v29_v29 = vmax.f32 %v28_v17, %v21_v14  ;;  %v41_v30 = vadd.f32 %v40_v18, %v21_v14  ;;  %v23_v33 = vld [vmem:[%s134_s0 + $0x78] sm:$0xff] }
   0x8   :  { %v34_v35 = vmax.f32 %v33_v27, %v19_v23  ;;  %v46_v36 = vadd.f32 %v45_v28, %v19_v23  ;;  %v32_v38 = vmax.f32 %v31_v31, %v22_v26  ;;  %v44_v39 = vadd.f32 %v43_v32, %v22_v26 }
   0x9   :  { %v48_v34 = vmul.f32 0.25, %v38_v25  ;;  %v49_v37 = vmul.f32 0.25, %v41_v30 }
   0xa   :  { %v35_v41 = vmax.f32 %v34_v35, %v23_v33  ;;  %v47_v42 = vadd.f32 %v46_v36, %v23_v33  ;;  %v50_v44 = vmul.f32 0.25, %v44_v39 }
   0xb   :  { %v52_v40 = vadd.f32 %v48_v34, %v26_v24  ;;  %v53_v43 = vadd.f32 %v49_v37, %v29_v29 }
   0xc   :  { %v51_v45 = vmul.f32 0.25, %v47_v42  ;;  %v54_v46 = vadd.f32 %v50_v44, %v32_v38 }
   0xd   :  { %56 = vst [vmem:[%s135_s1] sm:$0xff] %v52_v40 }
   0xe   :  { %57 = vst [vmem:[%s135_s1 + $0x8] sm:$0xff] %v53_v43  ;;  %v55_v47 = vadd.f32 %v51_v45, %v35_v41 }
   0xf   :  { %58 = vst [vmem:[%s135_s1 + $0x10] sm:$0xff] %v54_v46 }
  0x10   :  { %59 = vst [vmem:[%s135_s1 + $0x18] sm:$0xff] %v55_v47 }

// kernel: siu_forward.12
= control target key start
LH: loop header
LB: loop body
LE: loop exit
PB: predicated region body
PF: predicated region fallthrough
CT: control target
= control target key end

     0   :  { %s758_s15 = smov 0   ;;  %s848_s0 = inlined_call_operand.vmem [shape: f32[2,8,550], index: 0, kind: input, shape index: {}]   ;;  %s849_s1 = inlined_call_operand.vmem [shape: f32[8,72], index: 1, kind: input, shape index: {}]   ;;  %s850_s2 = inlined_call_operand.vmem [shape: f32[8,1], index: 2, kind: input, shape index: {}]   ;;  %s851_s3 = inlined_call_operand.vmem [shape: f32[8,1], index: 3, kind: input, shape index: {}]   ;;  %s852_s4 = inlined_call_operand.vmem [shape: f32[8,1024], index: 4, kind: output, shape index: {}]  }
   0x1 LB: > { %s764_s16 = sadd.s32 4294967295, %s722_s15   ;;  %p606_p0 = scmp.ge.s32.totalorder %s722_s15, 1  ;;  %s722_s15 = sphi %s758_s15, %s14_s15  }
   0x2   : > { %p162_p1 = scmp.lt.s32.totalorder %s722_s15, 3 }
   0x4   : > { %p163_p2 = pnand %p606_p0, %p162_p1 }
   0x5   : > { %p188_p3 = scmp.lt.s32.totalorder (!%p163_p2), %s764_s16, 1  ;;  %s724_s22 = smov (!%p163_p2), 91  }
   0x6   : > { %166 = sbr.rel (%p163_p2) target bundleno = 336 (0x150), region = 36  ;;  %s725_s23 = smov (!%p163_p2), 90  }
   0x7   : > { %s726_s24 = smov (!%p163_p2), 92   ;;  %s727_s25 = smov (!%p163_p2), 108  }
   0x8   : > { %s728_s26 = smov (!%p163_p2), 109   ;;  %s729_s27 = smov (!%p163_p2), 110  }
   0x9   : > { %s730_s28 = smov (!%p163_p2), 126   ;;  %s731_s29 = smov (!%p163_p2), 127  }
   0xa   : > { %s608_s10 = sshll.u32 (!%p163_p2), %s764_s16, 2 }
   0xb   : > { %s189_s17 = scalar_select %p188_p3, %s764_s16, 1  ;;  %vm384_vm0 = vcmask 736256   ;;  %vm361_vm1 = vcmask 744448   ;;  %vm338_vm2 = vcmask 752640   ;;  %vm315_vm3 = vcmask 883712   ;;  %v518_v60 = vld [vmem:[%s850_s2] sm:$0xff] }
   0xc   : > { %vm292_vm4 = vcmask 891904   ;;  %vm269_vm5 = vcmask 900096   ;;  %v528_v61 = vld [vmem:[%s851_s3] sm:$0xff]  ;;  %vm246_vm6 = vcmask 1031168   ;;  %vm223_vm7 = vcmask 1039360   ;;  %p194_p4 = scmp.lt.s32.totalorder %s608_s10, 7 }
   0xd   : > { %s616_s18 = smul.u32 40, %s189_s17  ;;  %vm434_vm8 = vcmask 588800  }
   0xe   : > { %s854_s10 = smov (!%p194_p4, %s608_s10), 7 }
   0xf   : > { %s192_s21 = scalar_lea.vmem %s848_s0, %s616_s18  ;;  %s609_s11 = sshll.u32 %s854_s10, 3 }
  0x10   : > { %v773_v0 = vld [vmem:[%s192_s21 + $0x10] sm:$0xff]  ;;  %v775_v1 = vld [vmem:[%s192_s21 + $0x18] sm:$0xff]  ;;  %v779_v3 = vld [vmem:[%s192_s21] sm:$0xff]  ;;  %s197_s14 = scalar_lea.vmem %s852_s4, %s609_s11 }
  0x11   : > { %v644_v2 = vpack.i.bf16 %v775_v1, %v773_v0  ;;  %v203_v4 = vld [vmem:[%s192_s21 + $0x20] sm:$0xff]  ;;  %v782_v6 = vld [vmem:[%s192_s21 + $0x8] sm:$0xff] }
  0x12   : > { %v649_v5 = vpack.i.bf16 %v779_v3, %v203_v4 }
  0x13   : > { %645 = vrot.lane.b32.xlu1 %v644_v2, %s724_s22  ;;  %635 = vrot.lane.b32.xlu0 %v644_v2, %s725_s23 }
  0x14   : > { %655 = vrot.lane.b32.xlu2 %v644_v2, %s726_s24 }
  0x1b   : > { %650 = vrot.lane.b32.xlu1 %v649_v5, %s724_s22  ;;  %640 = vrot.lane.b32.xlu0 %v649_v5, %s725_s23 }
  0x1c   : > { %376 = vrot.lane.b32.xlu2 %v782_v6, %s725_s23 }
  0x23   : > { %665 = vrot.lane.b32.xlu1 %v644_v2, %s727_s25  ;;  %660 = vrot.lane.b32.xlu0 %v649_v5, %s726_s24 }
  0x24   : > { %353 = vrot.lane.b32.xlu2 %v782_v6, %s724_s22 }
  0x2b   : > { %675 = vrot.lane.b32.xlu1 %v644_v2, %s728_s26  ;;  %670 = vrot.lane.b32.xlu0 %v649_v5, %s727_s25 }
  0x2c   : > { %330 = vrot.lane.b32.xlu2 %v782_v6, %s726_s24 }
  0x33   : > { %685 = vrot.lane.b32.xlu1 %v644_v2, %s729_s27  ;;  %680 = vrot.lane.b32.xlu0 %v649_v5, %s728_s26 }
  0x34   : > { %307 = vrot.lane.b32.xlu2 %v782_v6, %s727_s25 }
  0x3b   : > { %695 = vrot.lane.b32.xlu1 %v644_v2, %s730_s28  ;;  %690 = vrot.lane.b32.xlu0 %v649_v5, %s729_s27 }
  0x3c   : > { %284 = vrot.lane.b32.xlu2 %v782_v6, %s728_s26 }
  0x43   : > { %705 = vrot.lane.b32.xlu1 %v644_v2, %s731_s29  ;;  %700 = vrot.lane.b32.xlu0 %v649_v5, %s730_s28 }
  0x44   : > { %261 = vrot.lane.b32.xlu2 %v782_v6, %s729_s27 }
  0x4b   : > { %238 = vrot.lane.b32.xlu1 %v782_v6, %s730_s28  ;;  %710 = vrot.lane.b32.xlu0 %v649_v5, %s731_s29  ;;  %v732_v5 = vmov 0  }
  0x4c   : > { %215 = vrot.lane.b32.xlu2 %v782_v6, %s731_s29  ;;  %714 = vset.pattern.permute.xlu0 %v732_v5 }
  0x4d   : > { %715 = vset.pattern.permute.xlu1 %v732_v5 }
  0x53   : > { %521 = vperm.xlu0 %714, %v518_v60   ;;  %531 = vperm.xlu1 %715, %v528_v61  }
  0x6e   : > { %v656_v7 = vpop.permute.xlu2 %655 }
  0x6f   : > { %v658_v10 = vunpack.i.h.bf16 %v656_v7  ;;  %v657_v11 = vunpack.i.l.bf16 %v656_v7 }
  0x71   : > { %v341_v24 = vsel %vm338_vm2, %v657_v11, %v658_v10 }
  0x76   : > { %v377_v8 = vpop.permute.xlu2 %376 }
  0x7e   : > { %v354_v9 = vpop.permute.xlu2 %353 }
  0x85   : > { %v646_v12 = vpop.permute.xlu1 %645  ;;  %v636_v13 = vpop.permute.xlu0 %635 }
  0x86   : > { %v648_v14 = vunpack.i.h.bf16 %v646_v12  ;;  %v647_v15 = vunpack.i.l.bf16 %v646_v12  ;;  %v638_v16 = vunpack.i.h.bf16 %v636_v13  ;;  %v637_v17 = vunpack.i.l.bf16 %v636_v13  ;;  %v331_v18 = vpop.permute.xlu2 %330 }
  0x87   : > { %v340_v23 = vsel %vm338_vm2, %v331_v18, %v657_v11 }
  0x88   : > { %v386_v19 = vsel %vm384_vm0, %v377_v8, %v637_v17  ;;  %v387_v20 = vsel %vm384_vm0, %v637_v17, %v638_v16  ;;  %v363_v21 = vsel %vm361_vm1, %v354_v9, %v647_v15  ;;  %v364_v22 = vsel %vm361_vm1, %v647_v15, %v648_v14 }
  0x89   : > { %465 = vmatpush.msra.mxu1 %v386_v19  ;;  %485 = vmatpush.msra.mxu2 %v387_v20 }
  0x8b   : > { %466 = vmatpush.msra.mxu1 %v363_v21  ;;  %486 = vmatpush.msra.mxu2 %v364_v22 }
  0x8d   : > { %v651_v25 = vpop.permute.xlu1 %650  ;;  %v641_v26 = vpop.permute.xlu0 %640  ;;  %467 = vmatpush.msra.mxu1 %v340_v23  ;;  %487 = vmatpush.msra.mxu2 %v341_v24 }
  0x8e   : > { %v653_v27 = vunpack.i.h.bf16 %v651_v25  ;;  %v652_v28 = vunpack.i.l.bf16 %v651_v25  ;;  %v643_v29 = vunpack.i.h.bf16 %v641_v26  ;;  %v642_v30 = vunpack.i.l.bf16 %v641_v26  ;;  %v308_v34 = vpop.permute.xlu2 %307 }
  0x90   : > { %v385_v31 = vsel %vm384_vm0, %v643_v29, %v377_v8  ;;  %v388_v32 = vsel %vm384_vm0, %v638_v16, %v642_v30  ;;  %v362_v33 = vsel %vm361_vm1, %v653_v27, %v354_v9  ;;  %v365_v35 = vsel %vm361_vm1, %v648_v14, %v652_v28  ;;  %v397_v27 = vld [vmem:[%s849_s1] sm:$0xff] }
  0x91   : > { %445 = vmatpush.msra.mxu0 %v385_v31  ;;  %505 = vmatpush.msra.mxu3 %v388_v32 }
  0x93   : > { %506 = vmatpush.msra.mxu3 %v365_v35  ;;  %446 = vmatpush.msra.mxu0 %v362_v33 }
  0x95   : > { %v666_v36 = vpop.permute.xlu1 %665  ;;  %v661_v37 = vpop.permute.xlu0 %660 }
  0x96   : > { %v668_v38 = vunpack.i.h.bf16 %v666_v36  ;;  %v667_v39 = vunpack.i.l.bf16 %v666_v36  ;;  %v663_v40 = vunpack.i.h.bf16 %v661_v37  ;;  %v662_v41 = vunpack.i.l.bf16 %v661_v37  ;;  %v285_v46 = vpop.permute.xlu2 %284 }
  0x98   : > { %v339_v42 = vsel %vm338_vm2, %v663_v40, %v331_v18  ;;  %v342_v43 = vsel %vm338_vm2, %v658_v10, %v662_v41  ;;  %v317_v44 = vsel %vm315_vm3, %v308_v34, %v667_v39  ;;  %v318_v45 = vsel %vm315_vm3, %v667_v39, %v668_v38 }
  0x99   : > { %447 = vmatpush.msra.mxu0 %v339_v42  ;;  %507 = vmatpush.msra.mxu3 %v342_v43 }
  0x9a   : > { %468 = vmatpush.msra.mxu1 %v317_v44  ;;  %488 = vmatpush.msra.mxu2 %v318_v45 }
  0x9d   : > { %v676_v47 = vpop.permute.xlu1 %675  ;;  %v671_v48 = vpop.permute.xlu0 %670 }
  0x9e   : > { %v678_v49 = vunpack.i.h.bf16 %v676_v47  ;;  %v677_v50 = vunpack.i.l.bf16 %v676_v47  ;;  %v673_v51 = vunpack.i.h.bf16 %v671_v48  ;;  %v672_v52 = vunpack.i.l.bf16 %v671_v48  ;;  %v262_v57 = vpop.permute.xlu2 %261 }
  0xa0   : > { %v316_v53 = vsel %vm315_vm3, %v673_v51, %v308_v34  ;;  %v319_v54 = vsel %vm315_vm3, %v668_v38, %v672_v52  ;;  %v294_v55 = vsel %vm292_vm4, %v285_v46, %v677_v50  ;;  %v295_v56 = vsel %vm292_vm4, %v677_v50, %v678_v49 }
  0xa1   : > { %448 = vmatpush.msra.mxu0 %v316_v53  ;;  %508 = vmatpush.msra.mxu3 %v319_v54 }
  0xa2   : > { %469 = vmatpush.msra.mxu1 %v294_v55  ;;  %489 = vmatpush.msra.mxu2 %v295_v56 }
  0xa5   : > { %v686_v58 = vpop.permute.xlu1 %685  ;;  %v681_v59 = vpop.permute.xlu0 %680 }
  0xa6   : > { %v688_v62 = vunpack.i.h.bf16 %v686_v58  ;;  %v687_v63 = vunpack.i.l.bf16 %v686_v58  ;;  %v683_v2 = vunpack.i.h.bf16 %v681_v59  ;;  %v682_v4 = vunpack.i.l.bf16 %v681_v59  ;;  %v216_v29 = vpop.permute.xlu2 %215 }
  0xa8   : > { %v293_v7 = vsel %vm292_vm4, %v683_v2, %v285_v46  ;;  %v296_v8 = vsel %vm292_vm4, %v678_v49, %v682_v4  ;;  %v271_v9 = vsel %vm269_vm5, %v262_v57, %v687_v63  ;;  %v272_v10 = vsel %vm269_vm5, %v687_v63, %v688_v62 }
  0xa9   : > { %449 = vmatpush.msra.mxu0 %v293_v7  ;;  %509 = vmatpush.msra.mxu3 %v296_v8 }
  0xaa   : > { %470 = vmatpush.msra.mxu1 %v271_v9  ;;  %490 = vmatpush.msra.mxu2 %v272_v10 }
  0xad   : > { %v696_v11 = vpop.permute.xlu1 %695  ;;  %v691_v12 = vpop.permute.xlu0 %690 }
  0xae   : > { %v698_v13 = vunpack.i.h.bf16 %v696_v11  ;;  %v697_v14 = vunpack.i.l.bf16 %v696_v11  ;;  %v693_v15 = vunpack.i.h.bf16 %v691_v12  ;;  %v692_v16 = vunpack.i.l.bf16 %v691_v12 }
  0xb0   : > { %v270_v17 = vsel %vm269_vm5, %v693_v15, %v262_v57  ;;  %v273_v18 = vsel %vm269_vm5, %v688_v62, %v692_v16  ;;  %v249_v19 = vsel %vm246_vm6, %v697_v14, %v698_v13 }
  0xb1   : > { %450 = vmatpush.msra.mxu0 %v270_v17  ;;  %510 = vmatpush.msra.mxu3 %v273_v18 }
  0xb2   : > { %491 = vmatpush.msra.mxu2 %v249_v19 }
  0xb5   : > { %v706_v20 = vpop.permute.xlu1 %705  ;;  %v701_v21 = vpop.permute.xlu0 %700 }
  0xb6   : > { %v708_v22 = vunpack.i.h.bf16 %v706_v20  ;;  %v707_v23 = vunpack.i.l.bf16 %v706_v20  ;;  %v702_v24 = vunpack.i.l.bf16 %v701_v21  ;;  %v703_v28 = vunpack.i.h.bf16 %v701_v21 }
  0xb8   : > { %v250_v25 = vsel %vm246_vm6, %v698_v13, %v702_v24  ;;  %v226_v26 = vsel %vm223_vm7, %v707_v23, %v708_v22  ;;  %v225_v37 = vsel %vm223_vm7, %v216_v29, %v707_v23 }
  0xb9   : > { %511 = vmatpush.msra.mxu3 %v250_v25  ;;  %492 = vmatpush.msra.mxu2 %v226_v26 }
  0xbb   : > { %493 = vmatpush.msra.mxu2 %v773_v0 }
  0xbc   : > { %612 = vmatmul.msk.f32.vlgmr.msra.gmra.mxu2 %vm434_vm8, %v397_v27 }
  0xbd   : > { %v239_v30 = vpop.permute.xlu1 %238  ;;  %v711_v31 = vpop.permute.xlu0 %710 }
  0xbe   : > { %v713_v32 = vunpack.i.h.bf16 %v711_v31  ;;  %v712_v33 = vunpack.i.l.bf16 %v711_v31  ;;  %v247_v34 = vsel %vm246_vm6, %v703_v28, %v239_v30  ;;  %v248_v35 = vsel %vm246_vm6, %v239_v30, %v697_v14 }
  0xbf   : > { %451 = vmatpush.msra.mxu0 %v247_v34  ;;  %471 = vmatpush.msra.mxu1 %v248_v35 }
  0xc0   : > { %v224_v36 = vsel %vm223_vm7, %v713_v32, %v216_v29  ;;  %v227_v0 = vsel %vm223_vm7, %v708_v22, %v712_v33 }
  0xc1   : > { %452 = vmatpush.msra.mxu0 %v224_v36  ;;  %472 = vmatpush.msra.mxu1 %v225_v37 }
  0xc2   : > { %512 = vmatpush.msra.mxu3 %v227_v0 }
  0xc3   : > { %453 = vmatpush.msra.mxu0 %v779_v3  ;;  %473 = vmatpush.msra.mxu1 %v782_v6 }
  0xc4   : > { %513 = vmatpush.msra.mxu3 %v775_v1  ;;  %610 = vmatmul.msk.f32.vlgmr.msra.gmra.mxu0 %vm434_vm8, %v397_v27 }
  0xc5   : > { %613 = vmatmul.msk.f32.vlgmr.msra.gmra.mxu3 %vm434_vm8, %v397_v27  ;;  %611 = vmatmul.msk.f32.vlgmr.msra.gmra.mxu1 %vm434_vm8, %v397_v27  ;;  %v522_v38 = vpop.permute.xlu0 %521  ;;  %v532_v42 = vpop.permute.xlu1 %531 }
 0x13f   : > { %v495_v39 = vpop.f32.mrf.mxu2 }
 0x140   : > { %v526_v40 = vmul.f32 %v522_v38, %v495_v39 }
 0x141   : > { %v455_v41 = vpop.f32.mrf.mxu0 }
 0x142   : > { %v524_v43 = vmul.f32 %v522_v38, %v455_v41  ;;  %v475_v3 = vpop.f32.mrf.mxu1  ;;  %v536_v6 = vadd.f32 %v532_v42, %v526_v40 }
 0x143   : > { %v525_v44 = vmul.f32 %v522_v38, %v475_v3 }
 0x144   : > { %v534_v1 = vadd.f32 %v532_v42, %v524_v43  ;;  %v540_v47 = vmax.f32 %v536_v6, 0.0 }
 0x145   : > { %v535_v45 = vadd.f32 %v532_v42, %v525_v44 }
 0x146   : > { %v538_v46 = vmax.f32 %v534_v1, 0.0  ;;  %544 = vst [vmem:[%s197_s14 + $0x10] sm:$0xff] %v540_v47 }
 0x147   : > { %v539_v48 = vmax.f32 %v535_v45, 0.0 }
 0x148   : > { %542 = vst [vmem:[%s197_s14] sm:$0xff] %v538_v46  ;;  %v515_v49 = vpop.f32.mrf.mxu3 }
 0x149   : > { %543 = vst [vmem:[%s197_s14 + $0x8] sm:$0xff] %v539_v48  ;;  %v527_v50 = vmul.f32 %v522_v38, %v515_v49 }
 0x14b   : > { %v537_v51 = vadd.f32 %v532_v42, %v527_v50 }
 0x14d   : > { %v541_v52 = vmax.f32 %v537_v51, 0.0 }
 0x14f   : > { %545 = vst [vmem:[%s197_s14 + $0x18] sm:$0xff] %v541_v52 }
 0x150 PF: > { %s14_s15 = sadd.s32 1, %s722_s15  }
 0x151   : > { %p11_p5 = scmp.ge.s32.totalorder %s14_s15, 4  }
 0x153   :  { %13 = sbr.rel (!%p11_p5) target bundleno = 1 (0x1), region = 66 }

// kernel: siu_forward.14
= control target key start
LH: loop header
LB: loop body
LE: loop exit
PB: predicated region body
PF: predicated region fallthrough
CT: control target
= control target key end

     0   :  { %s270_s19 = smov 107   ;;  %s271_s20 = smov 106   ;;  %vm122_vm0 = vcmask 867328   ;;  %vm109_vm1 = vcmask 875520   ;;  %vm96_vm2 = vcmask 883712   ;;  %v278_v25 = vmov 0   ;;  %s344_s0 = inlined_call_operand.vmem [shape: f32[1,8,278], index: 0, kind: input, shape index: {}]   ;;  %s345_s2 = inlined_call_operand.vmem [shape: f32[8,1], index: 2, kind: input, shape index: {}]   ;;  %s346_s3 = inlined_call_operand.vmem [shape: f32[8,1], index: 3, kind: input, shape index: {}]   ;;  %s347_s1 = inlined_call_operand.vmem [shape: f32[8,72], index: 1, kind: input, shape index: {}]   ;;  %s348_s4 = inlined_call_operand.vmem [shape: f32[8,256], index: 4, kind: output, shape index: {}]  }
   0x1   :  { %v307_v0 = vld [vmem:[%s344_s0] sm:$0xff]  ;;  %v312_v1 = vld [vmem:[%s344_s0 + $0x8] sm:$0xff]  ;;  %s272_s21 = smov 108   ;;  %v19_v3 = vld [vmem:[%s344_s0 + $0x10] sm:$0xff]  ;;  %s273_s24 = smov 116   ;;  %267 = vset.pattern.permute.xlu1 %v278_v25  ;;  %268 = vset.pattern.permute.xlu2 %v278_v25  ;;  %vm83_vm3 = vcmask 949248  }
   0x2   :  { %v232_v2 = vpack.i.bf16 %v312_v1, %v307_v0  ;;  %s274_s25 = smov 117   ;;  %s275_s26 = smov 118   ;;  %v192_v23 = vld [vmem:[%s345_s2] sm:$0xff]  ;;  %vm70_vm4 = vcmask 957440   ;;  %269 = vset.pattern.permute.xlu0 %v278_v25  ;;  %vm57_vm5 = vcmask 965632   ;;  %vm44_vm6 = vcmask 1031168  }
   0x3   :  { %s276_s27 = smov 126   ;;  %s277_s28 = smov 127   ;;  %v200_v24 = vld [vmem:[%s346_s3] sm:$0xff]  ;;  %vm31_vm7 = vcmask 1039360   ;;  %vm148_vm8 = vcmask 588800  }
   0x4   :  { %233 = vrot.lane.b32.xlu1 %v232_v2, %s270_s19  ;;  %228 = vrot.lane.b32.xlu0 %v232_v2, %s271_s20  ;;  %v129_v53 = vld [vmem:[%s347_s1] sm:$0xff] }
   0x5   :  { %238 = vrot.lane.b32.xlu2 %v232_v2, %s272_s21 }
   0xc   :  { %107 = vrot.lane.b32.xlu1 %v19_v3, %s270_s19  ;;  %120 = vrot.lane.b32.xlu0 %v19_v3, %s271_s20 }
   0xd   :  { %94 = vrot.lane.b32.xlu2 %v19_v3, %s272_s21 }
  0x14   :  { %243 = vrot.lane.b32.xlu0 %v232_v2, %s273_s24  ;;  %81 = vrot.lane.b32.xlu1 %v19_v3, %s273_s24 }
  0x15   :  { %248 = vrot.lane.b32.xlu2 %v232_v2, %s274_s25 }
  0x1c   :  { %68 = vrot.lane.b32.xlu0 %v19_v3, %s274_s25  ;;  %253 = vrot.lane.b32.xlu1 %v232_v2, %s275_s26 }
  0x1d   :  { %55 = vrot.lane.b32.xlu2 %v19_v3, %s275_s26 }
  0x24   :  { %258 = vrot.lane.b32.xlu0 %v232_v2, %s276_s27  ;;  %42 = vrot.lane.b32.xlu1 %v19_v3, %s276_s27 }
  0x25   :  { %263 = vrot.lane.b32.xlu2 %v232_v2, %s277_s28 }
  0x2c   :  { %29 = vrot.lane.b32.xlu0 %v19_v3, %s277_s28  ;;  %195 = vperm.xlu1 %267, %v192_v23  }
  0x2d   :  { %203 = vperm.xlu2 %268, %v200_v24  }
  0x5f   :  { %v239_v4 = vpop.permute.xlu2 %238 }
  0x60   :  { %v241_v6 = vunpack.i.h.bf16 %v239_v4  ;;  %v240_v7 = vunpack.i.l.bf16 %v239_v4 }
  0x62   :  { %v97_v16 = vsel %vm96_vm2, %v240_v7, %v241_v6 }
  0x67   :  { %v95_v5 = vpop.permute.xlu2 %94 }
  0x68   :  { %v98_v22 = vsel %vm96_vm2, %v241_v6, %v95_v5 }
  0x6f   :  { %v249_v17 = vpop.permute.xlu2 %248 }
  0x70   :  { %v251_v26 = vunpack.i.h.bf16 %v249_v17  ;;  %v250_v27 = vunpack.i.l.bf16 %v249_v17 }
  0x72   :  { %v71_v35 = vsel %vm70_vm4, %v250_v27, %v251_v26 }
  0x76   :  { %v234_v8 = vpop.permute.xlu1 %233  ;;  %v229_v9 = vpop.permute.xlu0 %228 }
  0x77   :  { %v236_v10 = vunpack.i.h.bf16 %v234_v8  ;;  %v235_v11 = vunpack.i.l.bf16 %v234_v8  ;;  %v231_v12 = vunpack.i.h.bf16 %v229_v9  ;;  %v230_v13 = vunpack.i.l.bf16 %v229_v9  ;;  %v56_v32 = vpop.permute.xlu2 %55 }
  0x79   :  { %v123_v14 = vsel %vm122_vm0, %v230_v13, %v231_v12  ;;  %v110_v15 = vsel %vm109_vm1, %v235_v11, %v236_v10 }
  0x7a   :  { %159 = vmatpush.msra.mxu0 %v123_v14 }
  0x7c   :  { %160 = vmatpush.msra.mxu0 %v110_v15 }
  0x7e   :  { %v108_v18 = vpop.permute.xlu1 %107  ;;  %v121_v19 = vpop.permute.xlu0 %120  ;;  %161 = vmatpush.msra.mxu0 %v97_v16 }
  0x7f   :  { %v124_v20 = vsel %vm122_vm0, %v231_v12, %v121_v19  ;;  %v111_v21 = vsel %vm109_vm1, %v236_v10, %v108_v18  ;;  %v264_v43 = vpop.permute.xlu2 %263 }
  0x80   :  { %179 = vmatpush.msra.mxu1 %v124_v20  ;;  %v266_v44 = vunpack.i.h.bf16 %v264_v43  ;;  %v265_v45 = vunpack.i.l.bf16 %v264_v43 }
  0x82   :  { %180 = vmatpush.msra.mxu1 %v111_v21  ;;  %v32_v52 = vsel %vm31_vm7, %v265_v45, %v266_v44 }
  0x84   :  { %181 = vmatpush.msra.mxu1 %v98_v22 }
  0x86   :  { %v244_v28 = vpop.permute.xlu0 %243  ;;  %v82_v29 = vpop.permute.xlu1 %81 }
  0x87   :  { %v246_v30 = vunpack.i.h.bf16 %v244_v28  ;;  %v245_v31 = vunpack.i.l.bf16 %v244_v28  ;;  %v204_v58 = vpop.permute.xlu2 %203 }
  0x89   :  { %v84_v33 = vsel %vm83_vm3, %v245_v31, %v246_v30  ;;  %v85_v34 = vsel %vm83_vm3, %v246_v30, %v82_v29 }
  0x8a   :  { %162 = vmatpush.msra.mxu0 %v84_v33  ;;  %182 = vmatpush.msra.mxu1 %v85_v34 }
  0x8c   :  { %163 = vmatpush.msra.mxu0 %v71_v35 }
  0x8e   :  { %v69_v36 = vpop.permute.xlu0 %68  ;;  %v254_v37 = vpop.permute.xlu1 %253 }
  0x8f   :  { %v256_v38 = vunpack.i.h.bf16 %v254_v37  ;;  %v255_v39 = vunpack.i.l.bf16 %v254_v37  ;;  %v72_v40 = vsel %vm70_vm4, %v251_v26, %v69_v36 }
  0x90   :  { %183 = vmatpush.msra.mxu1 %v72_v40 }
  0x91   :  { %v59_v41 = vsel %vm57_vm5, %v256_v38, %v56_v32  ;;  %v58_v42 = vsel %vm57_vm5, %v255_v39, %v256_v38 }
  0x92   :  { %184 = vmatpush.msra.mxu1 %v59_v41  ;;  %164 = vmatpush.msra.mxu0 %v58_v42 }
  0x96   :  { %v259_v46 = vpop.permute.xlu0 %258  ;;  %v43_v47 = vpop.permute.xlu1 %42 }
  0x97   :  { %v261_v48 = vunpack.i.h.bf16 %v259_v46  ;;  %v260_v49 = vunpack.i.l.bf16 %v259_v46 }
  0x99   :  { %v45_v50 = vsel %vm44_vm6, %v260_v49, %v261_v48  ;;  %v46_v51 = vsel %vm44_vm6, %v261_v48, %v43_v47 }
  0x9a   :  { %165 = vmatpush.msra.mxu0 %v45_v50  ;;  %185 = vmatpush.msra.mxu1 %v46_v51 }
  0x9c   :  { %166 = vmatpush.msra.mxu0 %v32_v52 }
  0x9e   :  { %v30_v54 = vpop.permute.xlu0 %29  ;;  %167 = vmatpush.msra.mxu0 %v307_v0  ;;  %v196_v56 = vpop.permute.xlu1 %195 }
  0x9f   :  { %v33_v55 = vsel %vm31_vm7, %v266_v44, %v30_v54  ;;  %216 = vmatmul.msk.f32.vlgmr.msra.gmra.mxu0 %vm148_vm8, %v129_v53 }
  0xa0   :  { %186 = vmatpush.msra.mxu1 %v33_v55 }
  0xa2   :  { %187 = vmatpush.msra.mxu1 %v312_v1 }
  0xa3   :  { %217 = vmatmul.msk.f32.vlgmr.msra.gmra.mxu1 %vm148_vm8, %v129_v53 }
 0x11c   :  { %v169_v57 = vpop.f32.mrf.mxu0 }
 0x11d   :  { %v198_v59 = vmul.f32 %v196_v56, %v169_v57 }
 0x11f   :  { %v206_v60 = vadd.f32 %v204_v58, %v198_v59 }
 0x120   :  { %v189_v61 = vpop.f32.mrf.mxu1 }
 0x121   :  { %v199_v62 = vmul.f32 %v196_v56, %v189_v61  ;;  %v208_v63 = vmax.f32 %v206_v60, 0.0 }
 0x123   :  { %v207_v2 = vadd.f32 %v204_v58, %v199_v62  ;;  %210 = vst [vmem:[%s348_s4] sm:$0xff] %v208_v63 }
 0x125   :  { %v209_v0 = vmax.f32 %v207_v2, 0.0 }
 0x127   :  { %211 = vst [vmem:[%s348_s4 + $0x8] sm:$0xff] %v209_v0 }

// kernel: siu_forward.16
= control target key start
LH: loop header
LB: loop body
LE: loop exit
PB: predicated region body
PF: predicated region fallthrough
CT: control target
= control target key end

     0   :  { %v158_v3 = vmov 0   ;;  %vm36_vm0 = vcmask 195584   ;;  %s251_s2 = inlined_call_operand.vmem [shape: f32[8,512], index: 2, kind: input, shape index: {}]   ;;  %s252_s1 = inlined_call_operand.vmem [shape: f32[8,512], index: 1, kind: input, shape index: {}]   ;;  %s253_s0 = inlined_call_operand.vmem [shape: f32[8,512], index: 0, kind: input, shape index: {}]   ;;  %s254_s3 = inlined_call_operand.vmem [shape: f32[8,24], index: 3, kind: input, shape index: {}]   ;;  %s255_s4 = inlined_call_operand.vmem [shape: f32[8,1], index: 4, kind: input, shape index: {}]   ;;  %s256_s5 = inlined_call_operand.vmem [shape: f32[8,1], index: 5, kind: input, shape index: {}]   ;;  %s257_s6 = inlined_call_operand.vmem [shape: f32[8,512], index: 6, kind: output, shape index: {}]  }
   0x1   :  { %v31_v0 = vld [vmem:[%s251_s2] sm:$0xff]  ;;  %v32_v1 = vld [vmem:[%s251_s2 + $0x8] sm:$0xff]  ;;  %v33_v2 = vld [vmem:[%s251_s2 + $0x10] sm:$0xff]  ;;  %157 = vset.pattern.permute.xlu0 %v158_v3 }
   0x2   :  { %53 = vmatpush.msra.mxu0 %v31_v0  ;;  %73 = vmatpush.msra.mxu1 %v32_v1  ;;  %v34_v4 = vld [vmem:[%s251_s2 + $0x18] sm:$0xff]  ;;  %v27_v5 = vld [vmem:[%s252_s1] sm:$0xff]  ;;  %v28_v6 = vld [vmem:[%s252_s1 + $0x8] sm:$0xff] }
   0x3   :  { %93 = vmatpush.msra.mxu2 %v33_v2  ;;  %113 = vmatpush.msra.mxu3 %v34_v4  ;;  %v29_v7 = vld [vmem:[%s252_s1 + $0x10] sm:$0xff]  ;;  %v30_v8 = vld [vmem:[%s252_s1 + $0x18] sm:$0xff]  ;;  %v23_v9 = vld [vmem:[%s253_s0] sm:$0xff] }
   0x4   :  { %54 = vmatpush.msra.mxu0 %v27_v5  ;;  %74 = vmatpush.msra.mxu1 %v28_v6  ;;  %v24_v10 = vld [vmem:[%s253_s0 + $0x8] sm:$0xff]  ;;  %v25_v11 = vld [vmem:[%s253_s0 + $0x10] sm:$0xff]  ;;  %v26_v12 = vld [vmem:[%s253_s0 + $0x18] sm:$0xff] }
   0x5   :  { %94 = vmatpush.msra.mxu2 %v29_v7  ;;  %114 = vmatpush.msra.mxu3 %v30_v8  ;;  %v35_v13 = vld [vmem:[%s254_s3] sm:$0xff] }
   0x6   :  { %55 = vmatpush.msra.mxu0 %v23_v9  ;;  %75 = vmatpush.msra.mxu1 %v24_v10  ;;  %v120_v14 = vld [vmem:[%s255_s4] sm:$0xff] }
   0x7   :  { %95 = vmatpush.msra.mxu2 %v25_v11  ;;  %115 = vmatpush.msra.mxu3 %v26_v12  ;;  %v130_v15 = vld [vmem:[%s256_s5] sm:$0xff] }
   0x8   :  { %152 = vmatmul.msk.f32.vlgmr.msra.gmra.mxu0 %vm36_vm0, %v35_v13  ;;  %153 = vmatmul.msk.f32.vlgmr.msra.gmra.mxu1 %vm36_vm0, %v35_v13 }
   0x9   :  { %154 = vmatmul.msk.f32.vlgmr.msra.gmra.mxu2 %vm36_vm0, %v35_v13  ;;  %155 = vmatmul.msk.f32.vlgmr.msra.gmra.mxu3 %vm36_vm0, %v35_v13 }
   0xa   :  { %123 = vperm.xlu0 %157, %v120_v14  }
  0x12   :  { %133 = vperm.xlu0 %157, %v130_v15  }
  0x7c   :  { %v124_v16 = vpop.permute.xlu0 %123 }
  0x84   :  { %v134_v21 = vpop.permute.xlu0 %133 }
  0x85   :  { %v57_v17 = vpop.f32.mrf.mxu0  ;;  %v77_v18 = vpop.f32.mrf.mxu1 }
  0x86   :  { %v126_v19 = vmul.f32 %v124_v16, %v57_v17  ;;  %v127_v20 = vmul.f32 %v124_v16, %v77_v18 }
  0x88   :  { %v136_v22 = vadd.f32 %v134_v21, %v126_v19  ;;  %v137_v23 = vadd.f32 %v134_v21, %v127_v20 }
  0x8a   :  { %v140_v24 = vmax.f32 %v136_v22, 0.0  ;;  %v141_v25 = vmax.f32 %v137_v23, 0.0 }
  0x8c   :  { %144 = vst [vmem:[%s257_s6] sm:$0xff] %v140_v24  ;;  %v97_v26 = vpop.f32.mrf.mxu2  ;;  %v117_v27 = vpop.f32.mrf.mxu3 }
  0x8d   :  { %145 = vst [vmem:[%s257_s6 + $0x8] sm:$0xff] %v141_v25  ;;  %v128_v28 = vmul.f32 %v124_v16, %v97_v26  ;;  %v129_v29 = vmul.f32 %v124_v16, %v117_v27 }
  0x8f   :  { %v138_v30 = vadd.f32 %v134_v21, %v128_v28  ;;  %v139_v31 = vadd.f32 %v134_v21, %v129_v29 }
  0x91   :  { %v142_v32 = vmax.f32 %v138_v30, 0.0  ;;  %v143_v33 = vmax.f32 %v139_v31, 0.0 }
  0x93   :  { %146 = vst [vmem:[%s257_s6 + $0x10] sm:$0xff] %v142_v32 }
  0x94   :  { %147 = vst [vmem:[%s257_s6 + $0x18] sm:$0xff] %v143_v33 }

// kernel: siu_forward.19
= control target key start
LH: loop header
LB: loop body
LE: loop exit
PB: predicated region body
PF: predicated region fallthrough
CT: control target
= control target key end

     0   :  { %vm34_vm0 = vcmask 64512   ;;  %v269_v3 = vmov 0   ;;  %vm118_vm1 = vcmask 1042432   ;;  %s379_s0 = inlined_call_operand.vmem [shape: f32[8,512], index: 0, kind: input, shape index: {}]   ;;  %s380_s1 = inlined_call_operand.vmem [shape: f32[3,8], index: 1, kind: input, shape index: {}]   ;;  %s381_s2 = inlined_call_operand.vmem [shape: f32[3,1], index: 2, kind: input, shape index: {}]   ;;  %s382_s3 = inlined_call_operand.vmem [shape: f32[8,512], index: 3, kind: input, shape index: {}]   ;;  %s383_s4 = inlined_call_operand.vmem [shape: f32[8,512], index: 4, kind: input, shape index: {}]   ;;  %s384_s5 = inlined_call_operand.vmem [shape: f32[8,512], index: 5, kind: input, shape index: {}]   ;;  %s385_s6 = inlined_call_operand.vmem [shape: f32[8,512], index: 6, kind: output, shape index: {}]  }
   0x1   :  { %v24_v0 = vld [vmem:[%s379_s0] sm:$0xff]  ;;  %v25_v1 = vld [vmem:[%s379_s0 + $0x8] sm:$0xff]  ;;  %v26_v2 = vld [vmem:[%s379_s0 + $0x10] sm:$0xff]  ;;  %252 = vset.pattern.permute.xlu0 %v269_v3 }
   0x2   :  { %53 = vmatpush.msra.mxu0 %v24_v0  ;;  %73 = vmatpush.msra.mxu1 %v25_v1  ;;  %v27_v4 = vld [vmem:[%s379_s0 + $0x18] sm:$0xff]  ;;  %v23_v5 = vld [vmem:[%s380_s1] sm:$0x7] }
   0x3   :  { %93 = vmatpush.msra.mxu2 %v26_v2  ;;  %113 = vmatpush.msra.mxu3 %v27_v4  ;;  %v28_v6 = vld [vmem:[%s381_s2] sm:$0x7] }
   0x4   :  { %247 = vmatmul.msk.f32.vlgmr.msra.gmra.mxu0 %vm34_vm0, %v23_v5  ;;  %248 = vmatmul.msk.f32.vlgmr.msra.gmra.mxu1 %vm34_vm0, %v23_v5 }
   0x5   :  { %249 = vmatmul.msk.f32.vlgmr.msra.gmra.mxu2 %vm34_vm0, %v23_v5  ;;  %250 = vmatmul.msk.f32.vlgmr.msra.gmra.mxu3 %vm34_vm0, %v23_v5 }
   0x6   :  { %31 = vperm.xlu0 %252, %v28_v6  }
  0x78   :  { %v32_v7 = vpop.permute.xlu0 %31 }
  0x81   :  { %v55_v8 = vpop.f32.mrf.mxu0  ;;  %v75_v9 = vpop.f32.mrf.mxu1 }
  0x82   :  { %v56_v10 = vadd.f32 %v55_v8, %v32_v7  ;;  %v76_v11 = vadd.f32 %v75_v9, %v32_v7 }
  0x84   :  { %v119_v12 = vsel %vm118_vm1, %v56_v10, -inf  ;;  %v126_v13 = vsel %vm118_vm1, %v76_v11, -inf }
  0x85   :  { %v120_v14 = vrot.slane %v119_v12, 4  ;;  %v127_v15 = vrot.slane %v126_v13, 4 }
  0x87   :  { %v121_v16 = vmax.f32 %v119_v12, %v120_v14  ;;  %v128_v17 = vmax.f32 %v126_v13, %v127_v15 }
  0x88   :  { %v95_v18 = vpop.f32.mrf.mxu2  ;;  %v115_v19 = vpop.f32.mrf.mxu3 }
  0x89   :  { %v122_v20 = vrot.slane %v121_v16, 2  ;;  %v129_v21 = vrot.slane %v128_v17, 2  ;;  %v96_v22 = vadd.f32 %v95_v18, %v32_v7  ;;  %v116_v23 = vadd.f32 %v115_v19, %v32_v7 }
  0x8b   :  { %v123_v24 = vmax.f32 %v121_v16, %v122_v20  ;;  %v130_v25 = vmax.f32 %v128_v17, %v129_v21  ;;  %v133_v26 = vsel %vm118_vm1, %v96_v22, -inf  ;;  %v140_v27 = vsel %vm118_vm1, %v116_v23, -inf }
  0x8c   :  { %v134_v28 = vrot.slane %v133_v26, 4  ;;  %v141_v29 = vrot.slane %v140_v27, 4 }
  0x8d   :  { %v124_v30 = vrot.slane %v123_v24, 1  ;;  %v131_v31 = vrot.slane %v130_v25, 1 }
  0x8e   :  { %v135_v32 = vmax.f32 %v133_v26, %v134_v28  ;;  %v142_v33 = vmax.f32 %v140_v27, %v141_v29  ;;  %v196_v29 = vld [vmem:[%s382_s3 + $0x8] sm:$0xff] }
  0x8f   :  { %v125_v34 = vmax.f32 %v123_v24, %v124_v30  ;;  %v132_v35 = vmax.f32 %v130_v25, %v131_v31  ;;  %v207_v24 = vld [vmem:[%s383_s4] sm:$0xff]  ;;  %v208_v30 = vld [vmem:[%s383_s4 + $0x8] sm:$0xff] }
  0x90   :  { %v136_v36 = vrot.slane %v135_v32, 2  ;;  %v143_v37 = vrot.slane %v142_v33, 2  ;;  %v223_v31 = vld [vmem:[%s384_s5] sm:$0xff] }
  0x91   :  { %v147_v38 = vsub.f32 %v56_v10, %v125_v34  ;;  %v148_v39 = vsub.f32 %v76_v11, %v132_v35 }
  0x92   :  { %v137_v40 = vmax.f32 %v135_v32, %v136_v36  ;;  %v144_v41 = vmax.f32 %v142_v33, %v143_v37  ;;  %v224_v37 = vld [vmem:[%s384_s5 + $0x8] sm:$0xff] }
  0x93   :  { %v151_v42 = vmul.f32 1.442695, %v147_v38  ;;  %v153_v43 = vmul.f32 1.442695, %v148_v39 }
  0x94   :  { %v138_v44 = vrot.slane %v137_v40, 1  ;;  %v145_v45 = vrot.slane %v144_v41, 1 }
  0x95   :  { %253 = vpow2.f32 %v151_v42 }
  0x96   :  { %255 = vpow2.f32 %v153_v43  ;;  %v139_v46 = vmax.f32 %v137_v40, %v138_v44  ;;  %v146_v47 = vmax.f32 %v144_v41, %v145_v45 }
  0x98   :  { %v149_v48 = vsub.f32 %v96_v22, %v139_v46  ;;  %v150_v49 = vsub.f32 %v116_v23, %v146_v47  ;;  %v195_v23 = vld [vmem:[%s382_s3] sm:$0xff] }
  0x9a   :  { %v155_v50 = vmul.f32 1.442695, %v149_v48  ;;  %v157_v52 = vmul.f32 1.442695, %v150_v49  ;;  %v197_v48 = vld [vmem:[%s382_s3 + $0x10] sm:$0xff] }
  0x9b   :  { %v254_v51 = vpop.eup %253  ;;  %v209_v49 = vld [vmem:[%s383_s4 + $0x10] sm:$0xff] }
  0x9c   :  { %v256_v53 = vpop.eup %255  ;;  %v159_v54 = vsel %vm118_vm1, %v254_v51, 0.0  ;;  %257 = vpow2.f32 %v155_v50 }
  0x9d   :  { %v160_v55 = vrot.slane %v159_v54, 4  ;;  %v166_v56 = vsel %vm118_vm1, %v256_v53, 0.0  ;;  %259 = vpow2.f32 %v157_v52 }
  0x9e   :  { %v167_v57 = vrot.slane %v166_v56, 4 }
  0x9f   :  { %v161_v58 = vadd.f32 %v160_v55, %v159_v54  ;;  %v198_v55 = vld [vmem:[%s382_s3 + $0x18] sm:$0xff] }
  0xa0   :  { %v168_v59 = vadd.f32 %v167_v57, %v166_v56  ;;  %v210_v56 = vld [vmem:[%s383_s4 + $0x18] sm:$0xff]  ;;  %v225_v57 = vld [vmem:[%s384_s5 + $0x10] sm:$0xff] }
  0xa1   :  { %v162_v60 = vrot.slane %v161_v58, 2 }
  0xa2   :  { %v258_v61 = vpop.eup %257  ;;  %v169_v62 = vrot.slane %v168_v59, 2 }
  0xa3   :  { %v260_v63 = vpop.eup %259  ;;  %v163_v0 = vadd.f32 %v162_v60, %v161_v58  ;;  %v173_v1 = vsel %vm118_vm1, %v258_v61, 0.0 }
  0xa4   :  { %v170_v2 = vadd.f32 %v169_v62, %v168_v59  ;;  %v174_v3 = vrot.slane %v173_v1, 4  ;;  %v180_v4 = vsel %vm118_vm1, %v260_v63, 0.0 }
  0xa5   :  { %v164_v5 = vrot.slane %v163_v0, 1  ;;  %v181_v6 = vrot.slane %v180_v4, 4 }
  0xa6   :  { %v171_v7 = vrot.slane %v170_v2, 1  ;;  %v175_v8 = vadd.f32 %v174_v3, %v173_v1 }
  0xa7   :  { %v165_v9 = vadd.f32 %v164_v5, %v163_v0  ;;  %v182_v10 = vadd.f32 %v181_v6, %v180_v4 }
  0xa8   :  { %v172_v11 = vadd.f32 %v171_v7, %v170_v2  ;;  %v176_v12 = vrot.slane %v175_v8, 2 }
  0xa9   :  { %261 = vrcp.f32 %v165_v9  ;;  %v183_v13 = vrot.slane %v182_v10, 2 }
  0xaa   :  { %263 = vrcp.f32 %v172_v11  ;;  %v177_v14 = vadd.f32 %v176_v12, %v175_v8 }
  0xab   :  { %v184_v15 = vadd.f32 %v183_v13, %v182_v10 }
  0xac   :  { %v178_v16 = vrot.slane %v177_v14, 1 }
  0xad   :  { %v185_v17 = vrot.slane %v184_v15, 1 }
  0xae   :  { %v179_v18 = vadd.f32 %v178_v16, %v177_v14 }
  0xaf   :  { %v262_v19 = vpop.eup %261  ;;  %v186_v20 = vadd.f32 %v185_v17, %v184_v15 }
  0xb0   :  { %v264_v21 = vpop.eup %263  ;;  %v191_v22 = vmul.f32 %v262_v19, %v254_v51  ;;  %265 = vrcp.f32 %v179_v18 }
  0xb1   :  { %v192_v25 = vmul.f32 %v264_v21, %v256_v53  ;;  %267 = vrcp.f32 %v186_v20 }
  0xb2   :  { %v199_v26 = vperm.slane %v191_v22, 0  ;;  %v211_v27 = vperm.slane %v191_v22, 1  ;;  %v227_v28 = vperm.slane %v191_v22, 2 }
  0xb3   :  { %v200_v32 = vperm.slane %v192_v25, 0  ;;  %v212_v33 = vperm.slane %v192_v25, 1  ;;  %v228_v34 = vperm.slane %v192_v25, 2 }
  0xb4   :  { %v203_v35 = vmul.f32 %v199_v26, %v195_v23  ;;  %v215_v36 = vmul.f32 %v211_v27, %v207_v24  ;;  %v231_v42 = vmul.f32 %v227_v28, %v223_v31 }
  0xb5   :  { %v204_v38 = vmul.f32 %v200_v32, %v196_v29  ;;  %v216_v39 = vmul.f32 %v212_v33, %v208_v30  ;;  %v232_v45 = vmul.f32 %v228_v34, %v224_v37 }
  0xb6   :  { %v266_v40 = vpop.eup %265  ;;  %v219_v41 = vadd.f32 %v215_v36, %v203_v35 }
  0xb7   :  { %v268_v43 = vpop.eup %267  ;;  %v220_v44 = vadd.f32 %v216_v39, %v204_v38  ;;  %v193_v46 = vmul.f32 %v266_v40, %v258_v61 }
  0xb8   :  { %v235_v47 = vadd.f32 %v231_v42, %v219_v41  ;;  %v194_v50 = vmul.f32 %v268_v43, %v260_v63  ;;  %v226_v63 = vld [vmem:[%s384_s5 + $0x18] sm:$0xff] }
  0xb9   :  { %v236_v51 = vadd.f32 %v232_v45, %v220_v44  ;;  %v201_v52 = vperm.slane %v193_v46, 0  ;;  %v213_v53 = vperm.slane %v193_v46, 1  ;;  %v229_v54 = vperm.slane %v193_v46, 2 }
  0xba   :  { %239 = vst [vmem:[%s385_s6] sm:$0xff] %v235_v47  ;;  %v202_v58 = vperm.slane %v194_v50, 0  ;;  %v214_v59 = vperm.slane %v194_v50, 1  ;;  %v230_v60 = vperm.slane %v194_v50, 2 }
  0xbb   :  { %240 = vst [vmem:[%s385_s6 + $0x8] sm:$0xff] %v236_v51  ;;  %v205_v61 = vmul.f32 %v201_v52, %v197_v48  ;;  %v217_v62 = vmul.f32 %v213_v53, %v209_v49  ;;  %v233_v3 = vmul.f32 %v229_v54, %v225_v57 }
  0xbc   :  { %v206_v0 = vmul.f32 %v202_v58, %v198_v55  ;;  %v218_v1 = vmul.f32 %v214_v59, %v210_v56  ;;  %v234_v5 = vmul.f32 %v230_v60, %v226_v63 }
  0xbd   :  { %v221_v2 = vadd.f32 %v217_v62, %v205_v61 }
  0xbe   :  { %v222_v4 = vadd.f32 %v218_v1, %v206_v0 }
  0xbf   :  { %v237_v6 = vadd.f32 %v233_v3, %v221_v2 }
  0xc0   :  { %v238_v7 = vadd.f32 %v234_v5, %v222_v4 }
  0xc1   :  { %241 = vst [vmem:[%s385_s6 + $0x10] sm:$0xff] %v237_v6 }
  0xc2   :  { %242 = vst [vmem:[%s385_s6 + $0x18] sm:$0xff] %v238_v7 }

</bundles_post_ra>
